<compile_context>
chip_gen: v7x
topology: tpu7x:2x2x1
jax: 0.10.0
libtpu: 0.0.40
codegen_flags: <defaults>
</compile_context>

<pallas_src>
import numpy as np

import jax
import jax.numpy as jnp
from jax import lax
from jax.experimental import pallas as pl
from jax.experimental.pallas import tpu as pltpu


def _round_up(a, m):
    return -(-a // m) * m


# ---------------------------------------------------------------------------
# Weight preprocessing (done once, outside the hot path)
# ---------------------------------------------------------------------------
def _make_band(w_oihw, w_out_size, dtype):
    """Banded conv matrices: band[dh, w_in*Ci+ci, col(w,co)] = W[co,ci,dh,dw].

    Output column order col(w,co) = (w%2)*(W/2*Co) + (w//2)*Co + co so the 2x2
    pool along W becomes a max of two contiguous lane halves.  Zero padding of
    2 along W is handled by clipping the band.
    """
    Co, Ci, KH, KW = w_oihw.shape
    W = w_out_size
    Wo = W // 2
    dh, dw, ci, w, co = np.meshgrid(np.arange(KH), np.arange(KW), np.arange(Ci),
                                    np.arange(W), np.arange(Co), indexing="ij")
    dh, dw, ci, w, co = [a.ravel() for a in (dh, dw, ci, w, co)]
    w_in = w + dw - 2
    valid = (w_in >= 0) & (w_in < W)
    dh, dw, ci, w, co, w_in = [a[valid] for a in (dh, dw, ci, w, co, w_in)]
    rows = w_in * Ci + ci
    cols = (w % 2) * (Wo * Co) + (w // 2) * Co + co
    vals = w_oihw[co, ci, dh, dw]
    band = jnp.zeros((KH, W * Ci, W * Co), jnp.float32)
    band = band.at[dh, rows, cols].set(vals)
    return band.astype(dtype)


def prepare_params(params, dtype=jnp.bfloat16):
    # conv1 band with the 5 dh taps concatenated along K: (140, 448).
    band1 = _make_band(params["w1"], 28, dtype).reshape(5 * 28, 448)
    # conv2 bands kept per-dh (the shifts are data dependent): (5, 224, 448).
    band2 = _make_band(params["w2"], 14, dtype)
    bias1r = jnp.tile(params["b1"], 14).reshape(1, 14 * 16).astype(jnp.float32)
    bias2r = jnp.tile(params["b2"], 7).reshape(1, 7 * 32).astype(jnp.float32)
    # FC weight permuted so its rows follow the (ho, wo, co) feature layout.
    wfc = jnp.transpose(params["w_out"].reshape(10, 32, 7, 7), (2, 3, 1, 0))
    wfc = wfc.reshape(7 * 7 * 32, 10).astype(dtype)                  # (1568, 10)
    bfc = params["b_out"].reshape(1, 10).astype(jnp.float32)
    return {"band1": band1, "bias1r": bias1r, "band2": band2,
            "bias2r": bias2r, "wfc": wfc, "bfc": bfc}


def _make_pool_select(block_b, P):
    """0/1 bf16 matrix (2P, block_b*16) fusing the conv2 H-pool with a
    (ho, batch)-major reorder: rows [0,7*bb) pick even conv rows, rows
    [P, P+7*bb) pick the matching odd rows."""
    s = np.zeros((2 * P, block_b * 16), np.float32)
    for ho in range(7):
        for b in range(block_b):
            s[ho * block_b + b, b * 16 + 2 * ho] = 1.0
            s[P + ho * block_b + b, b * 16 + 2 * ho + 1] = 1.0
    return jnp.asarray(s, jnp.bfloat16)


# ---------------------------------------------------------------------------
# Fused Pallas kernel (one grid step = one batch block)
# ---------------------------------------------------------------------------
def _cnn_fused_kernel(xe_ref, xo_ref, band1_ref, bias1_ref, band2_ref,
                      bias2_ref, sel_ref, wfc_ref, bfc_ref,
                      logits_ref, feat_ref):
    f32 = jnp.float32
    bf16 = jnp.bfloat16

    # ---- conv1: one dh-concatenated matmul (K=140) per output-row parity -----
    acc_e = jnp.dot(xe_ref[...], band1_ref[...], preferred_element_type=f32)
    acc_o = jnp.dot(xo_ref[...], band1_ref[...], preferred_element_type=f32)
    hp1 = jnp.maximum(acc_e, acc_o)                       # 2x2 pool, H (VPU max)
    p1 = jnp.maximum(hp1[:, :224], hp1[:, 224:])          # 2x2 pool, W via lanes
    a1 = jnp.maximum(p1 + bias1_ref[...], 0.0).astype(bf16)   # (bb*16, 224)

    # ---- conv2: 5 accumulated MXU matmuls (K=224), batch-stacked shifts ------
    M = a1.shape[0]
    r = lax.broadcasted_iota(jnp.int32, (M, 1), 0) % 16   # row within image slot

    def shift_rows(v, d):
        # s[i] = v[i + d], zero-filled at the ends of the stacked block.
        z = jnp.zeros((abs(d), v.shape[1]), v.dtype)
        if d > 0:
            return jnp.concatenate([v[d:], z], axis=0)
        return jnp.concatenate([z, v[:d]], axis=0)

    acc2 = jnp.dot(a1, band2_ref[2], preferred_element_type=f32)    # dh = 2 (d=0)
    for d in (-2, -1, 1, 2):
        shifted = shift_rows(a1, d)
        mask = (r + d >= 0) & (r + d < 14)               # conv zero-padding in H
        lhs = jnp.where(mask, shifted, 0.0)
        acc2 += jnp.dot(lhs, band2_ref[d + 2], preferred_element_type=f32)
    q2 = jnp.maximum(acc2[:, :224], acc2[:, 224:])        # W pool   (bb*16, 224)

    # ---- conv2 H-pool + (ho, b) reorder: one bf16 selection matmul + VPU max -
    sel_out = jnp.dot(sel_ref[...], q2.astype(bf16), preferred_element_type=f32)
    P = sel_out.shape[0] // 2
    pooled = jnp.maximum(sel_out[:P], sel_out[P:])        # (P, 224), 8-aligned halves
    a2 = jnp.maximum(pooled + bias2_ref[...], 0.0)        # bias + ReLU (f32)
    feat_ref[0] = a2                                      # lane-dense feature store

    # ---- FC head: 7 matmuls of (block_b, 224) @ (224, 10), one logits store --
    a2b = a2.astype(bf16)
    bb = logits_ref.shape[1]
    lg = jnp.zeros((bb, 10), f32)
    for ho in range(7):
        lg += jnp.dot(a2b[ho * bb:(ho + 1) * bb, :],
                      wfc_ref[ho * 224:(ho + 1) * 224, :],
                      preferred_element_type=f32)
    logits_ref[0] = lg + bfc_ref[...]


# ---------------------------------------------------------------------------
# Wrapper
# ---------------------------------------------------------------------------
def cnn_forward(x_nchw, prep, block_b=None):
    """Reproduces CNN.forward: returns (logits (B,10), flat features (B,1568))."""
    B = x_nchw.shape[0]
    if block_b is None:
        block_b = max(1, min(B // 2, 32)) if B > 1 else 1
    nblocks = -(-B // block_b)
    B_pad = nblocks * block_b

    x = x_nchw[:, 0, :, :].astype(jnp.float32)
    if B_pad != B:
        x = jnp.concatenate(
            [x, jnp.zeros((B_pad - B, 28, 28), x.dtype)], axis=0)

    # H padding (2) + im2col over the 5 kernel-row offsets: lanes = (dh, w).
    xpad = jnp.pad(x, ((0, 0), (2, 2), (0, 0)))                       # (Bp,32,28)
    win = xpad[:, jnp.arange(28)[:, None] + jnp.arange(5)[None, :], :]  # (Bp,28,5,28)
    col = win.reshape(B_pad, 28, 140)

    def stack(rows):        # (Bp,14,140) -> (Bp*16,140): 16-row slots per image
        rows = jnp.pad(rows, ((0, 0), (0, 2), (0, 0)))
        return rows.reshape(B_pad * 16, 140).astype(jnp.bfloat16)

    xe = stack(col[:, 0::2])          # even conv1 output rows (pool partner A)
    xo = stack(col[:, 1::2])          # odd  conv1 output rows (pool partner B)

    Mb = block_b * 16
    P = _round_up(7 * block_b, 8)
    sel = _make_pool_select(block_b, P)                    # (2P, Mb) bf16 constant

    logits3, feat3 = pl.pallas_call(
        _cnn_fused_kernel,
        out_shape=(jax.ShapeDtypeStruct((nblocks, block_b, 10), jnp.float32),
                   jax.ShapeDtypeStruct((nblocks, P, 224), jnp.float32)),
        grid=(nblocks,),
        in_specs=[
            pl.BlockSpec((Mb, 140), lambda i: (i, 0)),            # xe (per block)
            pl.BlockSpec((Mb, 140), lambda i: (i, 0)),            # xo (per block)
            pl.BlockSpec((140, 448), lambda i: (0, 0)),           # band1 (resident)
            pl.BlockSpec((1, 224), lambda i: (0, 0)),             # bias1
            pl.BlockSpec((5, 224, 448), lambda i: (0, 0, 0)),     # band2 (resident)
            pl.BlockSpec((1, 224), lambda i: (0, 0)),             # bias2
            pl.BlockSpec((2 * P, Mb), lambda i: (0, 0)),          # pool/reorder sel
            pl.BlockSpec((1568, 10), lambda i: (0, 0)),           # fc weight
            pl.BlockSpec((1, 10), lambda i: (0, 0)),              # fc bias
        ],
        out_specs=(pl.BlockSpec((1, block_b, 10), lambda i: (i, 0, 0)),
                   pl.BlockSpec((1, P, 224), lambda i: (i, 0, 0))),
        compiler_params=pltpu.CompilerParams(
            dimension_semantics=("parallel",)),
    )(xe, xo, prep["band1"], prep["bias1r"], prep["band2"], prep["bias2r"],
      sel, prep["wfc"], prep["bfc"])

    logits = logits3.reshape(B_pad, 10)[:B]
    # Features come out (block, ho, b_in_block, wo, c2); permute to PyTorch
    # NCHW flatten order (pure layout plumbing on a tiny array).
    feat = feat3[:, :7 * block_b, :].reshape(nblocks, 7, block_b, 7, 32)
    flat = feat.transpose(0, 2, 4, 1, 3).reshape(B_pad, 32 * 7 * 7)[:B]
    return logits, flat


# ---------------------------------------------------------------------------
# Deterministic parameter init (shapes from CNN.__init__) + plain-JAX reference
# ---------------------------------------------------------------------------
def init_params(key):
    ks = jax.random.split(key, 6)
    return {
        "w1": 0.08 * jax.random.normal(ks[0], (16, 1, 5, 5), jnp.float32),
        "b1": 0.01 * jax.random.normal(ks[1], (16,), jnp.float32),
        "w2": 0.05 * jax.random.normal(ks[2], (32, 16, 5, 5), jnp.float32),
        "b2": 0.01 * jax.random.normal(ks[3], (32,), jnp.float32),
        "w_out": 0.02 * jax.random.normal(ks[4], (10, 32 * 7 * 7), jnp.float32),
        "b_out": 0.01 * jax.random.normal(ks[5], (10,), jnp.float32),
    }


def cnn_reference(x_nchw, params):
    dn = ("NCHW", "OIHW", "NCHW")

    def block(x, w, b):
        y = lax.conv_general_dilated(x, w, (1, 1), [(2, 2), (2, 2)],
                                     dimension_numbers=dn)
        y = jnp.maximum(y + b[None, :, None, None], 0.0)
        B, C, H, W = y.shape
        return y.reshape(B, C, H // 2, 2, W // 2, 2).max(axis=(3, 5))

    y = block(x_nchw, params["w1"], params["b1"])
    y = block(y, params["w2"], params["b2"])
    flat = y.reshape(y.shape[0], -1)
    logits = flat @ params["w_out"].T + params["b_out"]
    return logits, flat


# ---------------------------------------------------------------------------
if __name__ == "__main__":
    key = jax.random.PRNGKey(0)
    k_x, k_p = jax.random.split(key)

    # batch=2, MNIST-shaped input (28x28 is required by the 32*7*7 Linear layer)
    x = jax.random.normal(k_x, (2, 1, 28, 28), jnp.float32)
    params = init_params(k_p)
    prep = prepare_params(params)                # weight prep (done once)

    fwd = jax.jit(cnn_forward)
    logits, flat = fwd(x, prep)
    jax.block_until_ready((logits, flat))

    assert logits.shape == (2, 10) and flat.shape == (2, 32 * 7 * 7)

    ref_logits, ref_flat = cnn_reference(x, params)
    # bf16 matmul operands (f32 accumulation) => loose abs tolerance.
    err_l = float(jnp.max(jnp.abs(logits - ref_logits)))
    err_f = float(jnp.max(jnp.abs(flat - ref_flat)))
    assert err_l < 3e-2, err_l
    assert err_f < 3e-2, err_f

    print("KERNEL_OK")
</pallas_src>

<mosaic_0001>
module attributes {stable_mosaic.version = 11 : i64} {
  func.func @_cnn_fused_kernel(%arg0: i32, %arg1: memref<16x140xbf16, #tpu.memory_space<vmem>>, %arg2: memref<16x140xbf16, #tpu.memory_space<vmem>>, %arg3: memref<140x448xbf16, #tpu.memory_space<vmem>>, %arg4: memref<1x224xf32, #tpu.memory_space<vmem>>, %arg5: memref<5x224x448xbf16, #tpu.memory_space<vmem>>, %arg6: memref<1x224xf32, #tpu.memory_space<vmem>>, %arg7: memref<16x16xbf16, #tpu.memory_space<vmem>>, %arg8: memref<1568x10xbf16, #tpu.memory_space<vmem>>, %arg9: memref<1x10xf32, #tpu.memory_space<vmem>>, %arg10: memref<1x1x10xf32, #tpu.memory_space<vmem>>, %arg11: memref<1x8x224xf32, #tpu.memory_space<vmem>>) attributes {dimension_semantics = [#tpu.dimension_semantics<parallel>], iteration_bounds = array<i64: 2>, scalar_prefetch = 0 : i64, scratch_operands = 0 : i64, tpu.core_type = #tpu.core_type<tc>, window_params = [{transform_indices = @transform_0, window_bounds = array<i64: 16, 140>}, {transform_indices = @transform_1, window_bounds = array<i64: 16, 140>}, {pipeline_mode = #tpu.pipeline_mode<synchronous>, transform_indices = @transform_2, window_bounds = array<i64: 140, 448>}, {pipeline_mode = #tpu.pipeline_mode<synchronous>, transform_indices = @transform_3, window_bounds = array<i64: 1, 224>}, {pipeline_mode = #tpu.pipeline_mode<synchronous>, transform_indices = @transform_4, window_bounds = array<i64: 5, 224, 448>}, {pipeline_mode = #tpu.pipeline_mode<synchronous>, transform_indices = @transform_5, window_bounds = array<i64: 1, 224>}, {pipeline_mode = #tpu.pipeline_mode<synchronous>, transform_indices = @transform_6, window_bounds = array<i64: 16, 16>}, {pipeline_mode = #tpu.pipeline_mode<synchronous>, transform_indices = @transform_7, window_bounds = array<i64: 1568, 10>}, {pipeline_mode = #tpu.pipeline_mode<synchronous>, transform_indices = @transform_8, window_bounds = array<i64: 1, 10>}, {transform_indices = @transform_9, window_bounds = array<i64: 1, 1, 10>}, {transform_indices = @transform_10, window_bounds = array<i64: 1, 8, 224>}]} {
    %c0 = arith.constant 0 : index
    %c0_0 = arith.constant 0 : index
    %0 = vector.load %arg1[%c0, %c0_0] : memref<16x140xbf16, #tpu.memory_space<vmem>>, vector<16x140xbf16>
    %c0_1 = arith.constant 0 : index
    %c0_2 = arith.constant 0 : index
    %1 = vector.load %arg3[%c0_1, %c0_2] : memref<140x448xbf16, #tpu.memory_space<vmem>>, vector<140x448xbf16>
    %cst = arith.constant dense<0.000000e+00> : vector<16x448xf32>
    %2 = tpu.matmul %0, %1, %cst {dimension_numbers = #tpu.dot_dimension_numbers<[1], [0], [0], [1], [0, 0, 1, 1], [], []>} : vector<16x140xbf16>, vector<140x448xbf16>, vector<16x448xf32> -> vector<16x448xf32>
    %c0_3 = arith.constant 0 : index
    %c0_4 = arith.constant 0 : index
    %3 = vector.load %arg2[%c0_3, %c0_4] : memref<16x140xbf16, #tpu.memory_space<vmem>>, vector<16x140xbf16>
    %c0_5 = arith.constant 0 : index
    %c0_6 = arith.constant 0 : index
    %4 = vector.load %arg3[%c0_5, %c0_6] : memref<140x448xbf16, #tpu.memory_space<vmem>>, vector<140x448xbf16>
    %cst_7 = arith.constant dense<0.000000e+00> : vector<16x448xf32>
    %5 = tpu.matmul %3, %4, %cst_7 {dimension_numbers = #tpu.dot_dimension_numbers<[1], [0], [0], [1], [0, 0, 1, 1], [], []>} : vector<16x140xbf16>, vector<140x448xbf16>, vector<16x448xf32> -> vector<16x448xf32>
    %6 = arith.maximumf %2, %5 : vector<16x448xf32>
    %7 = vector.extract_strided_slice %6 {offsets = [0, 0], sizes = [16, 224], strides = [1, 1]} : vector<16x448xf32> to vector<16x224xf32>
    %8 = vector.extract_strided_slice %6 {offsets = [0, 224], sizes = [16, 224], strides = [1, 1]} : vector<16x448xf32> to vector<16x224xf32>
    %9 = arith.maximumf %7, %8 : vector<16x224xf32>
    %c0_8 = arith.constant 0 : index
    %c0_9 = arith.constant 0 : index
    %10 = vector.load %arg4[%c0_8, %c0_9] : memref<1x224xf32, #tpu.memory_space<vmem>>, vector<1x224xf32>
    %11 = vector.broadcast %10 : vector<1x224xf32> to vector<16x224xf32>
    %12 = arith.addf %9, %11 : vector<16x224xf32>
    %cst_10 = arith.constant 0.000000e+00 : f32
    %13 = vector.broadcast %cst_10 : f32 to vector<16x224xf32>
    %14 = arith.maximumf %12, %13 : vector<16x224xf32>
    %15 = arith.truncf %14 : vector<16x224xf32> to vector<16x224xbf16>
    %16 = tpu.iota {dimensions = array<i32: 0>} : vector<16x1xi32>
    %c16_i32 = arith.constant 16 : i32
    %c0_i32 = arith.constant 0 : i32
    %17 = arith.cmpi eq, %c16_i32, %c0_i32 : i32
    %c1_i32 = arith.constant 1 : i32
    %18 = arith.select %17, %c1_i32, %c16_i32 : i32
    %19 = vector.broadcast %18 : i32 to vector<16x1xi32>
    %20 = arith.remsi %16, %19 : vector<16x1xi32>
    %c0_i32_11 = arith.constant 0 : i32
    %21 = vector.broadcast %c0_i32_11 : i32 to vector<16x1xi32>
    %22 = arith.cmpi ne, %20, %21 : vector<16x1xi32>
    %c0_i32_12 = arith.constant 0 : i32
    %23 = vector.broadcast %c0_i32_12 : i32 to vector<16x1xi32>
    %24 = arith.cmpi slt, %20, %23 : vector<16x1xi32>
    %c0_i32_13 = arith.constant 0 : i32
    %25 = arith.cmpi slt, %18, %c0_i32_13 : i32
    %26 = vector.broadcast %25 : i1 to vector<16x1xi1>
    %27 = vector.broadcast %26 : vector<16x1xi1> to vector<16x1xi1>
    %28 = arith.xori %24, %27 : vector<16x1xi1>
    %29 = arith.andi %28, %22 : vector<16x1xi1>
    %30 = vector.broadcast %18 : i32 to vector<16x1xi32>
    %31 = arith.addi %20, %30 : vector<16x1xi32>
    %32 = arith.select %29, %31, %20 : vector<16x1xi1>, vector<16x1xi32>
    %c2 = arith.constant 2 : index
    %c0_14 = arith.constant 0 : index
    %c0_15 = arith.constant 0 : index
    %33 = vector.load %arg5[%c2, %c0_14, %c0_15] : memref<5x224x448xbf16, #tpu.memory_space<vmem>>, vector<1x224x448xbf16>
    %34 = vector.shape_cast %33 : vector<1x224x448xbf16> to vector<224x448xbf16>
    %cst_16 = arith.constant dense<0.000000e+00> : vector<16x448xf32>
    %35 = tpu.matmul %15, %34, %cst_16 {dimension_numbers = #tpu.dot_dimension_numbers<[1], [0], [0], [1], [0, 0, 1, 1], [], []>} : vector<16x224xbf16>, vector<224x448xbf16>, vector<16x448xf32> -> vector<16x448xf32>
    %cst_17 = arith.constant 0.000000e+00 : bf16
    %36 = vector.broadcast %cst_17 : bf16 to vector<2x224xbf16>
    %37 = vector.extract_strided_slice %15 {offsets = [0, 0], sizes = [14, 224], strides = [1, 1]} : vector<16x224xbf16> to vector<14x224xbf16>
    %38 = tpu.concatenate %36, %37 in 0 : vector<2x224xbf16>, vector<14x224xbf16> -> vector<16x224xbf16>
    %c-2_i32 = arith.constant -2 : i32
    %39 = vector.broadcast %c-2_i32 : i32 to vector<16x1xi32>
    %40 = arith.addi %32, %39 : vector<16x1xi32>
    %c0_i32_18 = arith.constant 0 : i32
    %41 = vector.broadcast %c0_i32_18 : i32 to vector<16x1xi32>
    %42 = arith.cmpi sge, %40, %41 : vector<16x1xi32>
    %c-2_i32_19 = arith.constant -2 : i32
    %43 = vector.broadcast %c-2_i32_19 : i32 to vector<16x1xi32>
    %44 = arith.addi %32, %43 : vector<16x1xi32>
    %c14_i32 = arith.constant 14 : i32
    %45 = vector.broadcast %c14_i32 : i32 to vector<16x1xi32>
    %46 = arith.cmpi slt, %44, %45 : vector<16x1xi32>
    %47 = arith.andi %42, %46 : vector<16x1xi1>
    %cst_20 = arith.constant 0.000000e+00 : f32
    %48 = arith.truncf %cst_20 : f32 to bf16
    %49 = vector.shape_cast %47 : vector<16x1xi1> to vector<16x1xi1>
    %50 = vector.broadcast %49 : vector<16x1xi1> to vector<16x224xi1>
    %51 = vector.broadcast %48 : bf16 to vector<16x224xbf16>
    %52 = arith.select %50, %38, %51 : vector<16x224xi1>, vector<16x224xbf16>
    %c0_21 = arith.constant 0 : index
    %c0_22 = arith.constant 0 : index
    %c0_23 = arith.constant 0 : index
    %53 = vector.load %arg5[%c0_21, %c0_22, %c0_23] : memref<5x224x448xbf16, #tpu.memory_space<vmem>>, vector<1x224x448xbf16>
    %54 = vector.shape_cast %53 : vector<1x224x448xbf16> to vector<224x448xbf16>
    %cst_24 = arith.constant dense<0.000000e+00> : vector<16x448xf32>
    %55 = tpu.matmul %52, %54, %cst_24 {dimension_numbers = #tpu.dot_dimension_numbers<[1], [0], [0], [1], [0, 0, 1, 1], [], []>} : vector<16x224xbf16>, vector<224x448xbf16>, vector<16x448xf32> -> vector<16x448xf32>
    %56 = arith.addf %35, %55 : vector<16x448xf32>
    %cst_25 = arith.constant 0.000000e+00 : bf16
    %57 = vector.broadcast %cst_25 : bf16 to vector<1x224xbf16>
    %58 = vector.extract_strided_slice %15 {offsets = [0, 0], sizes = [15, 224], strides = [1, 1]} : vector<16x224xbf16> to vector<15x224xbf16>
    %59 = tpu.concatenate %57, %58 in 0 : vector<1x224xbf16>, vector<15x224xbf16> -> vector<16x224xbf16>
    %c-1_i32 = arith.constant -1 : i32
    %60 = vector.broadcast %c-1_i32 : i32 to vector<16x1xi32>
    %61 = arith.addi %32, %60 : vector<16x1xi32>
    %c0_i32_26 = arith.constant 0 : i32
    %62 = vector.broadcast %c0_i32_26 : i32 to vector<16x1xi32>
    %63 = arith.cmpi sge, %61, %62 : vector<16x1xi32>
    %c-1_i32_27 = arith.constant -1 : i32
    %64 = vector.broadcast %c-1_i32_27 : i32 to vector<16x1xi32>
    %65 = arith.addi %32, %64 : vector<16x1xi32>
    %c14_i32_28 = arith.constant 14 : i32
    %66 = vector.broadcast %c14_i32_28 : i32 to vector<16x1xi32>
    %67 = arith.cmpi slt, %65, %66 : vector<16x1xi32>
    %68 = arith.andi %63, %67 : vector<16x1xi1>
    %cst_29 = arith.constant 0.000000e+00 : f32
    %69 = arith.truncf %cst_29 : f32 to bf16
    %70 = vector.shape_cast %68 : vector<16x1xi1> to vector<16x1xi1>
    %71 = vector.broadcast %70 : vector<16x1xi1> to vector<16x224xi1>
    %72 = vector.broadcast %69 : bf16 to vector<16x224xbf16>
    %73 = arith.select %71, %59, %72 : vector<16x224xi1>, vector<16x224xbf16>
    %c1 = arith.constant 1 : index
    %c0_30 = arith.constant 0 : index
    %c0_31 = arith.constant 0 : index
    %74 = vector.load %arg5[%c1, %c0_30, %c0_31] : memref<5x224x448xbf16, #tpu.memory_space<vmem>>, vector<1x224x448xbf16>
    %75 = vector.shape_cast %74 : vector<1x224x448xbf16> to vector<224x448xbf16>
    %cst_32 = arith.constant dense<0.000000e+00> : vector<16x448xf32>
    %76 = tpu.matmul %73, %75, %cst_32 {dimension_numbers = #tpu.dot_dimension_numbers<[1], [0], [0], [1], [0, 0, 1, 1], [], []>} : vector<16x224xbf16>, vector<224x448xbf16>, vector<16x448xf32> -> vector<16x448xf32>
    %77 = arith.addf %56, %76 : vector<16x448xf32>
    %cst_33 = arith.constant 0.000000e+00 : bf16
    %78 = vector.broadcast %cst_33 : bf16 to vector<1x224xbf16>
    %79 = vector.extract_strided_slice %15 {offsets = [1, 0], sizes = [15, 224], strides = [1, 1]} : vector<16x224xbf16> to vector<15x224xbf16>
    %80 = tpu.concatenate %79, %78 in 0 : vector<15x224xbf16>, vector<1x224xbf16> -> vector<16x224xbf16>
    %c1_i32_34 = arith.constant 1 : i32
    %81 = vector.broadcast %c1_i32_34 : i32 to vector<16x1xi32>
    %82 = arith.addi %32, %81 : vector<16x1xi32>
    %c0_i32_35 = arith.constant 0 : i32
    %83 = vector.broadcast %c0_i32_35 : i32 to vector<16x1xi32>
    %84 = arith.cmpi sge, %82, %83 : vector<16x1xi32>
    %c1_i32_36 = arith.constant 1 : i32
    %85 = vector.broadcast %c1_i32_36 : i32 to vector<16x1xi32>
    %86 = arith.addi %32, %85 : vector<16x1xi32>
    %c14_i32_37 = arith.constant 14 : i32
    %87 = vector.broadcast %c14_i32_37 : i32 to vector<16x1xi32>
    %88 = arith.cmpi slt, %86, %87 : vector<16x1xi32>
    %89 = arith.andi %84, %88 : vector<16x1xi1>
    %cst_38 = arith.constant 0.000000e+00 : f32
    %90 = arith.truncf %cst_38 : f32 to bf16
    %91 = vector.shape_cast %89 : vector<16x1xi1> to vector<16x1xi1>
    %92 = vector.broadcast %91 : vector<16x1xi1> to vector<16x224xi1>
    %93 = vector.broadcast %90 : bf16 to vector<16x224xbf16>
    %94 = arith.select %92, %80, %93 : vector<16x224xi1>, vector<16x224xbf16>
    %c3 = arith.constant 3 : index
    %c0_39 = arith.constant 0 : index
    %c0_40 = arith.constant 0 : index
    %95 = vector.load %arg5[%c3, %c0_39, %c0_40] : memref<5x224x448xbf16, #tpu.memory_space<vmem>>, vector<1x224x448xbf16>
    %96 = vector.shape_cast %95 : vector<1x224x448xbf16> to vector<224x448xbf16>
    %cst_41 = arith.constant dense<0.000000e+00> : vector<16x448xf32>
    %97 = tpu.matmul %94, %96, %cst_41 {dimension_numbers = #tpu.dot_dimension_numbers<[1], [0], [0], [1], [0, 0, 1, 1], [], []>} : vector<16x224xbf16>, vector<224x448xbf16>, vector<16x448xf32> -> vector<16x448xf32>
    %98 = arith.addf %77, %97 : vector<16x448xf32>
    %cst_42 = arith.constant 0.000000e+00 : bf16
    %99 = vector.broadcast %cst_42 : bf16 to vector<2x224xbf16>
    %100 = vector.extract_strided_slice %15 {offsets = [2, 0], sizes = [14, 224], strides = [1, 1]} : vector<16x224xbf16> to vector<14x224xbf16>
    %101 = tpu.concatenate %100, %99 in 0 : vector<14x224xbf16>, vector<2x224xbf16> -> vector<16x224xbf16>
    %c2_i32 = arith.constant 2 : i32
    %102 = vector.broadcast %c2_i32 : i32 to vector<16x1xi32>
    %103 = arith.addi %32, %102 : vector<16x1xi32>
    %c0_i32_43 = arith.constant 0 : i32
    %104 = vector.broadcast %c0_i32_43 : i32 to vector<16x1xi32>
    %105 = arith.cmpi sge, %103, %104 : vector<16x1xi32>
    %c2_i32_44 = arith.constant 2 : i32
    %106 = vector.broadcast %c2_i32_44 : i32 to vector<16x1xi32>
    %107 = arith.addi %32, %106 : vector<16x1xi32>
    %c14_i32_45 = arith.constant 14 : i32
    %108 = vector.broadcast %c14_i32_45 : i32 to vector<16x1xi32>
    %109 = arith.cmpi slt, %107, %108 : vector<16x1xi32>
    %110 = arith.andi %105, %109 : vector<16x1xi1>
    %cst_46 = arith.constant 0.000000e+00 : f32
    %111 = arith.truncf %cst_46 : f32 to bf16
    %112 = vector.shape_cast %110 : vector<16x1xi1> to vector<16x1xi1>
    %113 = vector.broadcast %112 : vector<16x1xi1> to vector<16x224xi1>
    %114 = vector.broadcast %111 : bf16 to vector<16x224xbf16>
    %115 = arith.select %113, %101, %114 : vector<16x224xi1>, vector<16x224xbf16>
    %c4 = arith.constant 4 : index
    %c0_47 = arith.constant 0 : index
    %c0_48 = arith.constant 0 : index
    %116 = vector.load %arg5[%c4, %c0_47, %c0_48] : memref<5x224x448xbf16, #tpu.memory_space<vmem>>, vector<1x224x448xbf16>
    %117 = vector.shape_cast %116 : vector<1x224x448xbf16> to vector<224x448xbf16>
    %cst_49 = arith.constant dense<0.000000e+00> : vector<16x448xf32>
    %118 = tpu.matmul %115, %117, %cst_49 {dimension_numbers = #tpu.dot_dimension_numbers<[1], [0], [0], [1], [0, 0, 1, 1], [], []>} : vector<16x224xbf16>, vector<224x448xbf16>, vector<16x448xf32> -> vector<16x448xf32>
    %119 = arith.addf %98, %118 : vector<16x448xf32>
    %120 = vector.extract_strided_slice %119 {offsets = [0, 0], sizes = [16, 224], strides = [1, 1]} : vector<16x448xf32> to vector<16x224xf32>
    %121 = vector.extract_strided_slice %119 {offsets = [0, 224], sizes = [16, 224], strides = [1, 1]} : vector<16x448xf32> to vector<16x224xf32>
    %122 = arith.maximumf %120, %121 : vector<16x224xf32>
    %c0_50 = arith.constant 0 : index
    %c0_51 = arith.constant 0 : index
    %123 = vector.load %arg7[%c0_50, %c0_51] : memref<16x16xbf16, #tpu.memory_space<vmem>>, vector<16x16xbf16>
    %124 = arith.truncf %122 : vector<16x224xf32> to vector<16x224xbf16>
    %cst_52 = arith.constant dense<0.000000e+00> : vector<16x224xf32>
    %125 = tpu.matmul %123, %124, %cst_52 {dimension_numbers = #tpu.dot_dimension_numbers<[1], [0], [0], [1], [0, 0, 1, 1], [], []>} : vector<16x16xbf16>, vector<16x224xbf16>, vector<16x224xf32> -> vector<16x224xf32>
    %126 = vector.extract_strided_slice %125 {offsets = [0, 0], sizes = [8, 224], strides = [1, 1]} : vector<16x224xf32> to vector<8x224xf32>
    %127 = vector.extract_strided_slice %125 {offsets = [8, 0], sizes = [8, 224], strides = [1, 1]} : vector<16x224xf32> to vector<8x224xf32>
    %128 = arith.maximumf %126, %127 : vector<8x224xf32>
    %c0_53 = arith.constant 0 : index
    %c0_54 = arith.constant 0 : index
    %129 = vector.load %arg6[%c0_53, %c0_54] : memref<1x224xf32, #tpu.memory_space<vmem>>, vector<1x224xf32>
    %130 = vector.broadcast %129 : vector<1x224xf32> to vector<8x224xf32>
    %131 = arith.addf %128, %130 : vector<8x224xf32>
    %cst_55 = arith.constant 0.000000e+00 : f32
    %132 = vector.broadcast %cst_55 : f32 to vector<8x224xf32>
    %133 = arith.maximumf %131, %132 : vector<8x224xf32>
    %c0_56 = arith.constant 0 : index
    %c0_57 = arith.constant 0 : index
    %c0_58 = arith.constant 0 : index
    %134 = vector.load %arg11[%c0_56, %c0_57, %c0_58] : memref<1x8x224xf32, #tpu.memory_space<vmem>>, vector<1x8x224xf32>
    %135 = vector.shape_cast %134 : vector<1x8x224xf32> to vector<8x224xf32>
    %136 = vector.shape_cast %133 : vector<8x224xf32> to vector<1x8x224xf32>
    tpu.vector_store %arg11[%c0_56, %c0_57, %c0_58], %136 {strides = array<i32>} : memref<1x8x224xf32, #tpu.memory_space<vmem>>, vector<1x8x224xf32>,
    %137 = arith.truncf %133 : vector<8x224xf32> to vector<8x224xbf16>
    %cst_59 = arith.constant 0.000000e+00 : f32
    %138 = vector.broadcast %cst_59 : f32 to vector<1x10xf32>
    %139 = vector.extract_strided_slice %137 {offsets = [0, 0], sizes = [1, 224], strides = [1, 1]} : vector<8x224xbf16> to vector<1x224xbf16>
    %c0_60 = arith.constant 0 : index
    %c0_61 = arith.constant 0 : index
    %140 = vector.load %arg8[%c0_60, %c0_61] : memref<1568x10xbf16, #tpu.memory_space<vmem>>, vector<224x10xbf16>
    %cst_62 = arith.constant dense<0.000000e+00> : vector<1x10xf32>
    %141 = tpu.matmul %139, %140, %cst_62 {dimension_numbers = #tpu.dot_dimension_numbers<[1], [0], [0], [1], [0, 0, 1, 1], [], []>} : vector<1x224xbf16>, vector<224x10xbf16>, vector<1x10xf32> -> vector<1x10xf32>
    %142 = arith.addf %138, %141 : vector<1x10xf32>
    %143 = vector.extract_strided_slice %137 {offsets = [1, 0], sizes = [1, 224], strides = [1, 1]} : vector<8x224xbf16> to vector<1x224xbf16>
    %c224 = arith.constant 224 : index
    %c0_63 = arith.constant 0 : index
    %144 = vector.load %arg8[%c224, %c0_63] : memref<1568x10xbf16, #tpu.memory_space<vmem>>, vector<224x10xbf16>
    %cst_64 = arith.constant dense<0.000000e+00> : vector<1x10xf32>
    %145 = tpu.matmul %143, %144, %cst_64 {dimension_numbers = #tpu.dot_dimension_numbers<[1], [0], [0], [1], [0, 0, 1, 1], [], []>} : vector<1x224xbf16>, vector<224x10xbf16>, vector<1x10xf32> -> vector<1x10xf32>
    %146 = arith.addf %142, %145 : vector<1x10xf32>
    %147 = vector.extract_strided_slice %137 {offsets = [2, 0], sizes = [1, 224], strides = [1, 1]} : vector<8x224xbf16> to vector<1x224xbf16>
    %c448 = arith.constant 448 : index
    %c0_65 = arith.constant 0 : index
    %148 = vector.load %arg8[%c448, %c0_65] : memref<1568x10xbf16, #tpu.memory_space<vmem>>, vector<224x10xbf16>
    %cst_66 = arith.constant dense<0.000000e+00> : vector<1x10xf32>
    %149 = tpu.matmul %147, %148, %cst_66 {dimension_numbers = #tpu.dot_dimension_numbers<[1], [0], [0], [1], [0, 0, 1, 1], [], []>} : vector<1x224xbf16>, vector<224x10xbf16>, vector<1x10xf32> -> vector<1x10xf32>
    %150 = arith.addf %146, %149 : vector<1x10xf32>
    %151 = vector.extract_strided_slice %137 {offsets = [3, 0], sizes = [1, 224], strides = [1, 1]} : vector<8x224xbf16> to vector<1x224xbf16>
    %c672 = arith.constant 672 : index
    %c0_67 = arith.constant 0 : index
    %152 = vector.load %arg8[%c672, %c0_67] : memref<1568x10xbf16, #tpu.memory_space<vmem>>, vector<224x10xbf16>
    %cst_68 = arith.constant dense<0.000000e+00> : vector<1x10xf32>
    %153 = tpu.matmul %151, %152, %cst_68 {dimension_numbers = #tpu.dot_dimension_numbers<[1], [0], [0], [1], [0, 0, 1, 1], [], []>} : vector<1x224xbf16>, vector<224x10xbf16>, vector<1x10xf32> -> vector<1x10xf32>
    %154 = arith.addf %150, %153 : vector<1x10xf32>
    %155 = vector.extract_strided_slice %137 {offsets = [4, 0], sizes = [1, 224], strides = [1, 1]} : vector<8x224xbf16> to vector<1x224xbf16>
    %c896 = arith.constant 896 : index
    %c0_69 = arith.constant 0 : index
    %156 = vector.load %arg8[%c896, %c0_69] : memref<1568x10xbf16, #tpu.memory_space<vmem>>, vector<224x10xbf16>
    %cst_70 = arith.constant dense<0.000000e+00> : vector<1x10xf32>
    %157 = tpu.matmul %155, %156, %cst_70 {dimension_numbers = #tpu.dot_dimension_numbers<[1], [0], [0], [1], [0, 0, 1, 1], [], []>} : vector<1x224xbf16>, vector<224x10xbf16>, vector<1x10xf32> -> vector<1x10xf32>
    %158 = arith.addf %154, %157 : vector<1x10xf32>
    %159 = vector.extract_strided_slice %137 {offsets = [5, 0], sizes = [1, 224], strides = [1, 1]} : vector<8x224xbf16> to vector<1x224xbf16>
    %c1120 = arith.constant 1120 : index
    %c0_71 = arith.constant 0 : index
    %160 = vector.load %arg8[%c1120, %c0_71] : memref<1568x10xbf16, #tpu.memory_space<vmem>>, vector<224x10xbf16>
    %cst_72 = arith.constant dense<0.000000e+00> : vector<1x10xf32>
    %161 = tpu.matmul %159, %160, %cst_72 {dimension_numbers = #tpu.dot_dimension_numbers<[1], [0], [0], [1], [0, 0, 1, 1], [], []>} : vector<1x224xbf16>, vector<224x10xbf16>, vector<1x10xf32> -> vector<1x10xf32>
    %162 = arith.addf %158, %161 : vector<1x10xf32>
    %163 = vector.extract_strided_slice %137 {offsets = [6, 0], sizes = [1, 224], strides = [1, 1]} : vector<8x224xbf16> to vector<1x224xbf16>
    %c1344 = arith.constant 1344 : index
    %c0_73 = arith.constant 0 : index
    %164 = vector.load %arg8[%c1344, %c0_73] : memref<1568x10xbf16, #tpu.memory_space<vmem>>, vector<224x10xbf16>
    %cst_74 = arith.constant dense<0.000000e+00> : vector<1x10xf32>
    %165 = tpu.matmul %163, %164, %cst_74 {dimension_numbers = #tpu.dot_dimension_numbers<[1], [0], [0], [1], [0, 0, 1, 1], [], []>} : vector<1x224xbf16>, vector<224x10xbf16>, vector<1x10xf32> -> vector<1x10xf32>
    %166 = arith.addf %162, %165 : vector<1x10xf32>
    %c0_75 = arith.constant 0 : index
    %c0_76 = arith.constant 0 : index
    %167 = vector.load %arg9[%c0_75, %c0_76] : memref<1x10xf32, #tpu.memory_space<vmem>>, vector<1x10xf32>
    %168 = arith.addf %166, %167 : vector<1x10xf32>
    %c0_77 = arith.constant 0 : index
    %c0_78 = arith.constant 0 : index
    %c0_79 = arith.constant 0 : index
    %169 = vector.load %arg10[%c0_77, %c0_78, %c0_79] : memref<1x1x10xf32, #tpu.memory_space<vmem>>, vector<1x1x10xf32>
    %170 = vector.shape_cast %169 : vector<1x1x10xf32> to vector<1x10xf32>
    %171 = vector.shape_cast %168 : vector<1x10xf32> to vector<1x1x10xf32>
    tpu.vector_store %arg10[%c0_77, %c0_78, %c0_79], %171 {strides = array<i32>} : memref<1x1x10xf32, #tpu.memory_space<vmem>>, vector<1x1x10xf32>,
    return
  }
  func.func @transform_0(%arg0: i32) -> (i32, i32) {
    %c0_i32 = arith.constant 0 : i32
    %c0_i32_0 = arith.constant 0 : i32
    return %arg0, %c0_i32 : i32, i32
  }
  func.func @transform_1(%arg0: i32) -> (i32, i32) {
    %c0_i32 = arith.constant 0 : i32
    %c0_i32_0 = arith.constant 0 : i32
    return %arg0, %c0_i32 : i32, i32
  }
  func.func @transform_2(%arg0: i32) -> (i32, i32) {
    %c0_i32 = arith.constant 0 : i32
    %c0_i32_0 = arith.constant 0 : i32
    %c0_i32_1 = arith.constant 0 : i32
    return %c0_i32, %c0_i32_0 : i32, i32
  }
  func.func @transform_3(%arg0: i32) -> (i32, i32) {
    %c0_i32 = arith.constant 0 : i32
    %c0_i32_0 = arith.constant 0 : i32
    %c0_i32_1 = arith.constant 0 : i32
    return %c0_i32, %c0_i32_0 : i32, i32
  }
  func.func @transform_4(%arg0: i32) -> (i32, i32, i32) {
    %c0_i32 = arith.constant 0 : i32
    %c0_i32_0 = arith.constant 0 : i32
    %c0_i32_1 = arith.constant 0 : i32
    %c0_i32_2 = arith.constant 0 : i32
    return %c0_i32, %c0_i32_0, %c0_i32_1 : i32, i32, i32
  }
  func.func @transform_5(%arg0: i32) -> (i32, i32) {
    %c0_i32 = arith.constant 0 : i32
    %c0_i32_0 = arith.constant 0 : i32
    %c0_i32_1 = arith.constant 0 : i32
    return %c0_i32, %c0_i32_0 : i32, i32
  }
  func.func @transform_6(%arg0: i32) -> (i32, i32) {
    %c0_i32 = arith.constant 0 : i32
    %c0_i32_0 = arith.constant 0 : i32
    %c0_i32_1 = arith.constant 0 : i32
    return %c0_i32, %c0_i32_0 : i32, i32
  }
  func.func @transform_7(%arg0: i32) -> (i32, i32) {
    %c0_i32 = arith.constant 0 : i32
    %c0_i32_0 = arith.constant 0 : i32
    %c0_i32_1 = arith.constant 0 : i32
    return %c0_i32, %c0_i32_0 : i32, i32
  }
  func.func @transform_8(%arg0: i32) -> (i32, i32) {
    %c0_i32 = arith.constant 0 : i32
    %c0_i32_0 = arith.constant 0 : i32
    %c0_i32_1 = arith.constant 0 : i32
    return %c0_i32, %c0_i32_0 : i32, i32
  }
  func.func @transform_9(%arg0: i32) -> (i32, i32, i32) {
    %c0_i32 = arith.constant 0 : i32
    %c0_i32_0 = arith.constant 0 : i32
    %c0_i32_1 = arith.constant 0 : i32
    return %arg0, %c0_i32, %c0_i32_0 : i32, i32, i32
  }
  func.func @transform_10(%arg0: i32) -> (i32, i32, i32) {
    %c0_i32 = arith.constant 0 : i32
    %c0_i32_0 = arith.constant 0 : i32
    %c0_i32_1 = arith.constant 0 : i32
    return %arg0, %c0_i32, %c0_i32_0 : i32, i32, i32
  }
}

</mosaic_0001>

<bundles_post_ra>
// kernel: cnn_forward.1
= control target key start
LH: loop header
LB: loop body
LE: loop exit
PB: predicated region body
PF: predicated region fallthrough
CT: control target
= control target key end

     0   :  { %s7830_s0 = inlined_call_operand.vmem [shape: bf16[32,140], index: 0, kind: input, shape index: {}]   ;;  %s7831_s1 = inlined_call_operand.vmem [shape: bf16[32,140], index: 1, kind: input, shape index: {}]   ;;  %s7832_s2 = inlined_call_operand.vmem [shape: bf16[140,448], index: 2, kind: input, shape index: {}]   ;;  %s7833_s3 = inlined_call_operand.vmem [shape: f32[1,224], index: 3, kind: input, shape index: {}]   ;;  %s7834_s4 = inlined_call_operand.vmem [shape: bf16[5,224,448], index: 4, kind: input, shape index: {}]   ;;  %s7835_s5 = inlined_call_operand.vmem [shape: f32[1,224], index: 5, kind: input, shape index: {}]   ;;  %s7836_s6 = inlined_call_operand.vmem [shape: bf16[16,16], index: 6, kind: input, shape index: {}]   ;;  %s7837_s7 = inlined_call_operand.vmem [shape: bf16[1568,10], index: 7, kind: input, shape index: {}]   ;;  %s7838_s8 = inlined_call_operand.vmem [shape: f32[1,10], index: 8, kind: input, shape index: {}]   ;;  %s7839_s9 = inlined_call_operand.hbm [shape: f32[2,1,10], index: 9, kind: output, shape index: {0}]   ;;  %s7840_s10 = inlined_call_operand.vmem [shape: f32[2,8,224], index: 10, kind: output, shape index: {1}]  }
   0x1   :  { %7841 = sst [smem:[#allocation5_spill]] %s7830_s0 }
   0x2   :  { %16 = vsyncpa [#allocation3], 0 }
   0x3   :  { %18 = vsyncpa [#allocation3 + $0x1], 0  ;;  %s6039_s13 = smov 0   ;;  %s6041_s14 = smov 0  }
   0x4   :  { %s6043_s15 = smov 0   ;;  %s6045_s16 = smov 0  }
   0x5 LB: > { %s6060_s17 = sadd.s32 4294967295, %s5978_s16   ;;  %s4549_s18 = sadd.s32 4294967294, %s5978_s16   ;;  %s5978_s16 = sphi %s6045_s16, %s7862_s16   ;;  %s5974_s15 = sphi %s6043_s15, %s7861_s15   ;;  %s5970_s14 = sphi %s6041_s14, %s7860_s14   ;;  %s5966_s13 = sphi %s6039_s13, %s7859_s13  }
   0x6   : > { %s6064_s19 = sadd.s32 1, %s5978_s16   ;;  %s230_s20 = sadd.s32 1, %s5974_s15 }
   0x7   : > { %s227_s21 = ssub.s32 %s5978_s16, %s6064_s19  ;;  %p240_p0 = scmp.ne.s32.totalorder %s5974_s15, %s5970_s14 }
   0x8   : > { %p228_p1 = scmp.eq.s32.totalorder %s227_s21, 0  ;;  %p241_p2 = scmp.eq.s32.totalorder %s6060_s17, 1 }
   0x9   : > { %p246_p3 = scmp.ne.s32.totalorder %s5970_s14, %s5966_s13  ;;  %p247_p4 = scmp.eq.s32.totalorder %s4549_s18, 1 }
   0xa   : > { %s6075_s22 = scalar_select %p228_p1, %s5974_s15, %s230_s20  }
   0xb   : > { %p6077_p5 = por %p241_p2, %p240_p0  ;;  %p6081_p6 = por %p247_p4, %p246_p3 }
   0xc   : > { %p4552_p7 = scmp.ge.s32.totalorder %s5978_s16, 1  ;;  %p332_p8 = scmp.lt.s32.totalorder %s5978_s16, 3 }
   0xe   : > { %p333_p9 = pnand %p4552_p7, %p332_p8 }
   0xf   : > { %v6090_v0 = vld [vmem:[%s7832_s2 + $0x4] ss:$16 sps:$4 sm:$0xff] (!%p333_p9)   ;;  %s4553_s27 = sshll.u32 (!%p333_p9), %s6060_s17, 1  ;;  %v6096_v1 = vld [vmem:[%s7832_s2] ss:$16 sps:$4 sm:$0xff] (!%p333_p9)   ;;  %s7844_s0 = sld [smem:[#allocation5_spill]] (!%p333_p9)  ;;  %v870_v62 = vlaneseq (!%p333_p9) }
  0x10   : > { %336 = sbr.rel (%p333_p9) target bundleno = 1661 (0x67d), region = 56  ;;  %p382_p10 = scmp.lt.s32.totalorder (!%p333_p9), %s4553_s27, 3  ;;  %643 = vmatprep.subr.bf16.mxu0 (!%p333_p9), %v6090_v0  ;;  %v6102_v2 = vld [vmem:[%s7832_s2 + $0x24] ss:$16 sps:$4 sm:$0xff] (!%p333_p9)   ;;  %v6108_v3 = vld [vmem:[%s7832_s2 + $0x20] ss:$16 sps:$4 sm:$0xff] (!%p333_p9)  }
  0x11   : > { %644 = vmatpush1.bf16.msra.mxu0 (!%p333_p9), %v6096_v1  ;;  %v6116_v4 = vld [vmem:[%s7832_s2 + $0x44] ss:$16 sps:$4 sm:$0xff] (!%p333_p9)   ;;  %v6122_v5 = vld [vmem:[%s7832_s2 + $0x40] ss:$16 sps:$4 sm:$0xff] (!%p333_p9)   ;;  %vm626_vm0 = vcmask (!%p333_p9), 97280   ;;  %vm630_vm1 = vcmask (!%p333_p9), 1045504  }
  0x12   : > { %645 = vmatprep.subr.bf16.mxu0 (!%p333_p9), %v6102_v2  ;;  %v6129_v6 = vld [vmem:[%s7832_s2 + $0x64] ss:$16 sps:$4 sm:$0xff] (!%p333_p9)   ;;  %v6142_v7 = vld [vmem:[%s7832_s2 + $0x60] ss:$16 sps:$4 sm:$0xff] (!%p333_p9)   ;;  %v5367_v10 = vld [vmem:[%s7832_s2 + $0x8] ss:$16 sps:$4 sm:$0xff] (!%p333_p9)  }
  0x13   : > { %v6148_v8 = vld [vmem:[%s7832_s2 + $0x84] ss:$16 sps:$4 sm:$0xff] (!%p333_p9)   ;;  %v5369_v11 = vld [vmem:[%s7832_s2 + $0xc] ss:$16 sps:$4 sm:$0xff] (!%p333_p9)   ;;  %v6161_v12 = vld [vmem:[%s7832_s2 + $0x80] ss:$16 sps:$4 sm:$0xff] (!%p333_p9)  }
  0x14   : > { %v5372_v13 = vld [vmem:[%s7832_s2 + $0x2c] ss:$16 sps:$4 sm:$0xff] (!%p333_p9)   ;;  %v6171_v14 = vld [vmem:[%s7832_s2 + $0xa4] ss:$16 sps:$4 sm:$0xff] (!%p333_p9)   ;;  %786 = vmatprep.subr.bf16.mxu1 (!%p333_p9), %v5369_v11  ;;  %v5370_v15 = vld [vmem:[%s7832_s2 + $0x28] ss:$16 sps:$4 sm:$0xff] (!%p333_p9)  }
  0x15   : > { %646 = vmatpush1.bf16.msra.mxu0 (!%p333_p9), %v6108_v3  ;;  %787 = vmatpush1.bf16.msra.mxu1 (!%p333_p9), %v5367_v10  ;;  %v5375_v16 = vld [vmem:[%s7832_s2 + $0x4c] ss:$16 sps:$4 sm:$0xff] (!%p333_p9)   ;;  %v6183_v17 = vld [vmem:[%s7832_s2 + $0xa0] ss:$16 sps:$4 sm:$0xff] (!%p333_p9)   ;;  %v6189_v18 = vld [vmem:[%s7832_s2 + $0xc4] ss:$16 sps:$4 sm:$0xff] (!%p333_p9)  }
  0x16   : > { %647 = vmatprep.subr.bf16.mxu0 (!%p333_p9), %v6116_v4  ;;  %788 = vmatprep.subr.bf16.mxu1 (!%p333_p9), %v5372_v13  ;;  %v5373_v19 = vld [vmem:[%s7832_s2 + $0x48] ss:$16 sps:$4 sm:$0xff] (!%p333_p9)   ;;  %v5378_v20 = vld [vmem:[%s7832_s2 + $0x6c] ss:$16 sps:$4 sm:$0xff] (!%p333_p9)   ;;  %v6201_v21 = vld [vmem:[%s7832_s2 + $0xc0] ss:$16 sps:$4 sm:$0xff] (!%p333_p9)  }
  0x17   : > { %s7864_s27 = smov (!%p382_p10, %s4553_s27), 3  ;;  %v6214_v22 = vld [vmem:[%s7832_s2 + $0xe4] ss:$16 sps:$4 sm:$0xff]   ;;  %v6219_v23 = vld [vmem:[%s7832_s2 + $0xe0] ss:$16 sps:$4 sm:$0xff]   ;;  %s5980_s25 = smov 32  }
  0x18   : > { %s5245_s28 = sshll.u32 %s7864_s27, 3  ;;  %v5376_v24 = vld [vmem:[%s7832_s2 + $0x68] ss:$16 sps:$4 sm:$0xff]   ;;  %v6227_v25 = vld [vmem:[%s7832_s2 + $0x104] ss:$16 sps:$4 sm:$0x3f]  }
  0x19   : > { %s6136_s18 = scalar_lea.vmem %s7844_s0, %s5245_s28  ;;  %648 = vmatpush1.bf16.msra.mxu0 %v6122_v5  ;;  %789 = vmatpush1.bf16.msra.mxu1 %v5370_v15  ;;  %s6208_s0 = scalar_lea.vmem %s7831_s1, %s5245_s28  ;;  %v5363_v26 = vld [vmem:[%s7832_s2 + $0x100] ss:$16 sps:$4 sm:$0x3f]   ;;  %v5381_v27 = vld [vmem:[%s7832_s2 + $0x8c] ss:$16 sps:$4 sm:$0xff]   ;;  %vm5981_vm7 = vmmov 1  }
  0x1a   : > { %649 = vmatprep.subr.bf16.mxu0 %v6129_v6  ;;  %v5366_v9 = vld [vmem:[%s6136_s18 + $0x4] ss:$8 sps:$4 sm:$0xff]   ;;  %790 = vmatprep.subr.bf16.mxu1 %v5375_v16  ;;  %v5379_v29 = vld [vmem:[%s7832_s2 + $0x88] ss:$16 sps:$4 sm:$0xff]   ;;  %v632_v32 = vsel %vm630_vm1, %v5363_v26, 0  ;;  %vm999_vm8 = vmpackc.low %vm5981_vm7, %vm5981_vm7  ;;  %vm855_vm12 = vcmask 261120  }
  0x1b   : > { %4600 = vmatprep.mubr.msk.bf16.mxu0 %vm626_vm0, %v5366_v9  ;;  %v5396_v28 = vld [vmem:[%s6208_s0 + $0x4] ss:$8 sps:$4 sm:$0xff]   ;;  %v5382_v31 = vld [vmem:[%s7832_s2 + $0xa8] ss:$16 sps:$4 sm:$0xff]   ;;  %v5397_v42 = vld [vmem:[%s7834_s4] ss:$16 sps:$4 sm:$0xff]  }
  0x1c   : > { %v5384_v30 = vld [vmem:[%s7832_s2 + $0xac] ss:$16 sps:$4 sm:$0xff]   ;;  %4608 = vmatprep.mubr.msk.bf16.mxu1 %vm626_vm0, %v5396_v28  ;;  %v5364_v33 = vld [vmem:[%s6136_s18] ss:$8 sps:$4 sm:$0xff]   ;;  %v5399_v43 = vld [vmem:[%s7834_s4 + $0x4] ss:$16 sps:$4 sm:$0xff]  }
  0x1d   : > { %650 = vmatpush1.bf16.msra.mxu0 %v6142_v7  ;;  %791 = vmatpush1.bf16.msra.mxu1 %v5373_v19  ;;  %v5387_v34 = vld [vmem:[%s7832_s2 + $0xcc] ss:$16 sps:$4 sm:$0xff]   ;;  %v5385_v35 = vld [vmem:[%s7832_s2 + $0xc8] ss:$16 sps:$4 sm:$0xff]   ;;  %v5405_v46 = vld [vmem:[%s7834_s4 + $0x24] ss:$16 sps:$4 sm:$0xff]  }
  0x1e   : > { %651 = vmatprep.subr.bf16.mxu0 %v6148_v8  ;;  %792 = vmatprep.subr.bf16.mxu1 %v5378_v20  ;;  %v5390_v36 = vld [vmem:[%s7832_s2 + $0xec] ss:$16 sps:$4 sm:$0xff]   ;;  %v5388_v37 = vld [vmem:[%s7832_s2 + $0xe8] ss:$16 sps:$4 sm:$0xff]   ;;  %v5403_v48 = vld [vmem:[%s7834_s4 + $0x20] ss:$16 sps:$4 sm:$0xff]  }
  0x1f   : > { %v5391_v38 = vld [vmem:[%s7832_s2 + $0x10c] ss:$16 sps:$4 sm:$0x3f]   ;;  %v5393_v39 = vld [vmem:[%s7832_s2 + $0x108] ss:$16 sps:$4 sm:$0x3f]  }
  0x20   : > { %v638_v40 = vsel %vm630_vm1, %v5393_v39, 0  ;;  %v5394_v41 = vld [vmem:[%s6208_s0] ss:$8 sps:$4 sm:$0xff]   ;;  %v5402_v45 = vld [vmem:[%s7834_s4 + $0xc] ss:$16 sps:$4 sm:$0xff]   ;;  %vm978_vm15 = vcmask 1040384  }
  0x21   : > { %652 = vmatpush1.bf16.msra.mxu0 %v6161_v12  ;;  %793 = vmatpush1.bf16.msra.mxu1 %v5376_v24  ;;  %v5400_v44 = vld [vmem:[%s7834_s4 + $0x8] ss:$16 sps:$4 sm:$0xff]   ;;  %v5408_v47 = vld [vmem:[%s7834_s4 + $0x2c] ss:$16 sps:$4 sm:$0xff]   ;;  %v5411_v58 = vld [vmem:[%s7834_s4 + $0x44] ss:$16 sps:$4 sm:$0xff]  }
  0x22   : > { %653 = vmatprep.subr.bf16.mxu0 %v6171_v14  ;;  %794 = vmatprep.subr.bf16.mxu1 %v5381_v27  ;;  %v5406_v49 = vld [vmem:[%s7834_s4 + $0x28] ss:$16 sps:$4 sm:$0xff]   ;;  %v5414_v59 = vld [vmem:[%s7834_s4 + $0x4c] ss:$16 sps:$4 sm:$0xff]   ;;  %v5409_v60 = vld [vmem:[%s7834_s4 + $0x40] ss:$16 sps:$4 sm:$0xff]  }
  0x23   : > { %v5412_v61 = vld [vmem:[%s7834_s4 + $0x48] ss:$16 sps:$4 sm:$0xff]   ;;  %v5417_v63 = vld [vmem:[%s7834_s4 + $0x64] ss:$16 sps:$4 sm:$0xff]   ;;  %p395_p11 = scmp.lt.s32.totalorder %s6060_s17, 1  ;;  %s5983_s28 = smov [#allocation2]  }
  0x24   : > { %v5448_v39 = vld [vmem:[%s7834_s4 + $0x108] ss:$16 sps:$4 sm:$0xff]  }
  0x25   : > { %654 = vmatpush1.bf16.msra.mxu0 %v6183_v17  ;;  %795 = vmatpush1.bf16.msra.mxu1 %v5379_v29  ;;  %s396_s26 = scalar_select %p395_p11, %s6060_s17, 1 }
  0x26   : > { %655 = vmatprep.subr.bf16.mxu0 %v6189_v18  ;;  %796 = vmatprep.subr.bf16.mxu1 %v5384_v30 }
  0x27   : > { %s5247_s29 = sshll.u32 %s396_s26, 4  ;;  %s5920_s26 = sshll.u32 %s5983_s28, 4  ;;  %s5921_s26 = int_to_ptr.vmem [resolvable:$false] %s5920_s26 }
  0x28   : > { %s399_s11 = scalar_lea.vmem %s7840_s10, %s5247_s29  ;;  %s372_s29 = sand.u32 1, %s5970_s14  }
  0x29   : > { %656 = vmatpush1.bf16.msra.mxu0 %v6201_v21  ;;  %797 = vmatpush1.bf16.msra.mxu1 %v5382_v31  ;;  %s373_s12 = scalar_lea.vmem [#allocation2], %s372_s29  ;;  %s5922_s0 = scalar_lea.vmem %s5921_s26, 32 }
  0x2a   : > { %657 = vmatprep.subr.bf16.mxu0 %v6214_v22  ;;  %798 = vmatprep.subr.bf16.mxu1 %v5387_v34  ;;  %s4454_s20 = sshll.u32 %s373_s12, 4  ;;  %s7790_s20 = int_to_ptr.vmem [resolvable:$true] %s4454_s20 }
  0x2b   : > { %p5923_p1 = scmp.lt.s32.totalorder %s7790_s20, %s5921_s26 }
  0x2d   : > { %658 = vmatpush1.bf16.msra.mxu0 %v6219_v23  ;;  %799 = vmatpush1.bf16.msra.mxu1 %v5385_v35 }
  0x2e   : > { %4599 = vmatprep.subr.msk.bf16.mxu0 %vm630_vm1, %v6227_v25  ;;  %800 = vmatprep.subr.bf16.mxu1 %v5390_v36 }
  0x31   : > { %660 = vmatpush1.bf16.msra.mxu0 %v632_v32  ;;  %801 = vmatpush1.bf16.msra.mxu1 %v5388_v37 }
  0x32   : > { %686 = vmatprep.subr.bf16.mxu0 %v5369_v11  ;;  %4607 = vmatprep.subr.msk.bf16.mxu1 %vm630_vm1, %v5391_v38 }
  0x34   : > { %676 = vmatmul.mubr.bf16.vlgmr.msra.gmra.mrb[0].mxu0 %v5364_v33 }
  0x35   : > { %687 = vmatpush1.bf16.msra.mxu0 %v5367_v10  ;;  %4602 = vmatprep.mubr.msk.bf16.mxu0 %vm626_vm0, %v5366_v9 }
  0x36   : > { %688 = vmatprep.subr.bf16.mxu0 %v5372_v13  ;;  %803 = vmatpush1.bf16.msra.mxu1 %v638_v40 }
  0x37   : > { %1391 = vmatprep.subr.bf16.mxu1 %v5402_v45 }
  0x39   : > { %689 = vmatpush1.bf16.msra.mxu0 %v5370_v15  ;;  %819 = vmatmul.mubr.bf16.vlgmr.msra.gmra.mrb[0].mxu1 %v5394_v41  ;;  %v5432_v15 = vld [vmem:[%s7834_s4 + $0xac] ss:$16 sps:$4 sm:$0xff]  }
  0x3a   : > { %690 = vmatprep.subr.bf16.mxu0 %v5375_v16  ;;  %1392 = vmatpush1.bf16.msra.mxu1 %v5400_v44 }
  0x3b   : > { %1393 = vmatprep.subr.bf16.mxu1 %v5408_v47 }
  0x3d   : > { %691 = vmatpush1.bf16.msra.mxu0 %v5373_v19  ;;  %v5427_v19 = vld [vmem:[%s7834_s4 + $0xa0] ss:$16 sps:$4 sm:$0xff]  }
  0x3e   : > { %692 = vmatprep.subr.bf16.mxu0 %v5378_v20  ;;  %1394 = vmatpush1.bf16.msra.mxu1 %v5406_v49  ;;  %v5430_v20 = vld [vmem:[%s7834_s4 + $0xa8] ss:$16 sps:$4 sm:$0xff]  }
  0x3f   : > { %1395 = vmatprep.subr.bf16.mxu1 %v5414_v59  ;;  %v5457_v59 = vld [vmem:[%s7834_s4 + $0x140] ss:$16 sps:$4 sm:$0xff]  }
  0x41   : > { %693 = vmatpush1.bf16.msra.mxu0 %v5376_v24  ;;  %v5433_v24 = vld [vmem:[%s7834_s4 + $0xc0] ss:$16 sps:$4 sm:$0xff]  }
  0x42   : > { %694 = vmatprep.subr.bf16.mxu0 %v5381_v27  ;;  %1396 = vmatpush1.bf16.msra.mxu1 %v5412_v61  ;;  %v5465_v61 = vld [vmem:[%s7834_s4 + $0x164] ss:$16 sps:$4 sm:$0xff]  }
  0x45   : > { %695 = vmatpush1.bf16.msra.mxu0 %v5379_v29 }
  0x46   : > { %696 = vmatprep.subr.bf16.mxu0 %v5384_v30  ;;  %v5439_v30 = vld [vmem:[%s7834_s4 + $0xe0] ss:$16 sps:$4 sm:$0xff]  }
  0x49   : > { %697 = vmatpush1.bf16.msra.mxu0 %v5382_v31  ;;  %v5441_v31 = vld [vmem:[%s7834_s4 + $0xe4] ss:$16 sps:$4 sm:$0xff]  }
  0x4a   : > { %698 = vmatprep.subr.bf16.mxu0 %v5387_v34 }
  0x4d   : > { %699 = vmatpush1.bf16.msra.mxu0 %v5385_v35  ;;  %v5447_v35 = vld [vmem:[%s7834_s4 + $0x104] ss:$16 sps:$4 sm:$0xff]  }
  0x4e   : > { %700 = vmatprep.subr.bf16.mxu0 %v5390_v36  ;;  %v5450_v36 = vld [vmem:[%s7834_s4 + $0x10c] ss:$16 sps:$4 sm:$0xff]  }
  0x51   : > { %701 = vmatpush1.bf16.msra.mxu0 %v5388_v37  ;;  %v5517_v37 = vld [vmem:[%s7834_s4 + $0x440] ss:$16 sps:$4 sm:$0xff]  }
  0x52   : > { %4601 = vmatprep.subr.msk.bf16.mxu0 %vm630_vm1, %v5391_v38  ;;  %v5445_v38 = vld [vmem:[%s7834_s4 + $0x100] ss:$16 sps:$4 sm:$0xff]  }
  0x55   : > { %703 = vmatpush1.bf16.msra.mxu0 %v638_v40  ;;  %v5453_v40 = vld [vmem:[%s7834_s4 + $0x124] ss:$16 sps:$4 sm:$0xff]  }
  0x56   : > { %743 = vmatprep.subr.bf16.mxu0 %v6090_v0  ;;  %v5420_v0 = vld [vmem:[%s7834_s4 + $0x6c] ss:$16 sps:$4 sm:$0xff]  }
  0x57   : > { %1397 = vmatprep.subr.bf16.mxu1 %v5420_v0  ;;  %v5466_v0 = vld [vmem:[%s7834_s4 + $0x168] ss:$16 sps:$4 sm:$0xff]  }
  0x58   : > { %719 = vmatmul.mubr.bf16.vlgmr.msra.gmra.mrb[4].mxu0 %v5364_v33  ;;  %v5444_v33 = vld [vmem:[%s7834_s4 + $0xec] ss:$16 sps:$4 sm:$0xff]  }
  0x59   : > { %744 = vmatpush1.bf16.msra.mxu0 %v6096_v1  ;;  %4606 = vmatprep.mubr.msk.bf16.mxu0 %vm626_vm0, %v5396_v28  ;;  %v5415_v1 = vld [vmem:[%s7834_s4 + $0x60] ss:$16 sps:$4 sm:$0xff]   ;;  %v5436_v28 = vld [vmem:[%s7834_s4 + $0xc8] ss:$16 sps:$4 sm:$0xff]  }
  0x5a   : > { %745 = vmatprep.subr.bf16.mxu0 %v6102_v2  ;;  %v5418_v2 = vld [vmem:[%s7834_s4 + $0x68] ss:$16 sps:$4 sm:$0xff]  }
  0x5b   : > { %1398 = vmatpush1.bf16.msra.mxu1 %v5418_v2  ;;  %v5474_v2 = vld [vmem:[%s7834_s4 + $0x18c] ss:$16 sps:$4 sm:$0xff]  }
  0x5d   : > { %746 = vmatpush1.bf16.msra.mxu0 %v6108_v3  ;;  %v6351_v3 = vshrl.u32 %v870_v62, 7  ;;  %v5468_v62 = vld [vmem:[%s7834_s4 + $0x16c] ss:$16 sps:$4 sm:$0xff]  }
  0x5e   : > { %747 = vmatprep.subr.bf16.mxu0 %v6116_v4  ;;  %v5423_v4 = vld [vmem:[%s7834_s4 + $0x84] ss:$16 sps:$4 sm:$0xff]  }
  0x5f   : > { %v897_v16 = vand.u32 15, %v6351_v3 }
  0x61   : > { %748 = vmatpush1.bf16.msra.mxu0 %v6122_v5  ;;  %v5426_v5 = vld [vmem:[%s7834_s4 + $0x8c] ss:$16 sps:$4 sm:$0xff]   ;;  %v1823_v26 = vadd.s32 4294967295, %v897_v16 }
  0x62   : > { %749 = vmatprep.subr.bf16.mxu0 %v6129_v6  ;;  %v5421_v6 = vld [vmem:[%s7834_s4 + $0x80] ss:$16 sps:$4 sm:$0xff]   ;;  %1399 = vmatprep.subr.bf16.mxu1 %v5426_v5  ;;  %v5472_v5 = vld [vmem:[%s7834_s4 + $0x188] ss:$16 sps:$4 sm:$0xff]  }
  0x63   : > { %vm1825_vm2 = vcmp.ge.s32.totalorder %v1823_v26, 0 }
  0x64   : > { %vm6415_vm4 = vmpackc.low %vm1825_vm2, %vm1825_vm2  ;;  %vm1344_vm2 = vcmask 785408  }
  0x65   : > { %750 = vmatpush1.bf16.msra.mxu0 %v6142_v7  ;;  %v5424_v7 = vld [vmem:[%s7834_s4 + $0x88] ss:$16 sps:$4 sm:$0xff]  }
  0x66   : > { %751 = vmatprep.subr.bf16.mxu0 %v6148_v8  ;;  %v892_v8 = vadd.s32 8, %v6351_v3  ;;  %1400 = vmatpush1.bf16.msra.mxu1 %v5424_v7  ;;  %v5480_v7 = vld [vmem:[%s7834_s4 + $0x1ac] ss:$16 sps:$4 sm:$0xff]  }
  0x67   : > { %1401 = vmatprep.subr.bf16.mxu1 %v5432_v15 }
  0x69   : > { %752 = vmatpush1.bf16.msra.mxu0 %v6161_v12 }
  0x6a   : > { %753 = vmatprep.subr.bf16.mxu0 %v6171_v14  ;;  %v5429_v14 = vld [vmem:[%s7834_s4 + $0xa4] ss:$16 sps:$4 sm:$0xff]   ;;  %1402 = vmatpush1.bf16.msra.mxu1 %v5430_v20 }
  0x6d   : > { %754 = vmatpush1.bf16.msra.mxu0 %v6183_v17 }
  0x6e   : > { %755 = vmatprep.subr.bf16.mxu0 %v6189_v18 }
  0x71   : > { %756 = vmatpush1.bf16.msra.mxu0 %v6201_v21  ;;  %v904_v21 = vand.u32 15, %v892_v8  ;;  %v5475_v8 = vld [vmem:[%s7834_s4 + $0x1a0] ss:$16 sps:$4 sm:$0xff]  }
  0x72   : > { %757 = vmatprep.subr.bf16.mxu0 %v6214_v22 }
  0x73   : > { %v1824_v27 = vadd.s32 4294967295, %v904_v21  ;;  %v2291_v29 = vadd.s32 1, %v904_v21  ;;  %v2756_v34 = vadd.s32 2, %v904_v21  ;;  %v986_v21 = vadd.s32 4294967294, %v897_v16 }
  0x75   : > { %758 = vmatpush1.bf16.msra.mxu0 %v6219_v23  ;;  %v5435_v23 = vld [vmem:[%s7834_s4 + $0xc4] ss:$16 sps:$4 sm:$0xff]   ;;  %vm1828_vm3 = vcmp.lt.s32.totalorder %v1824_v27, 14  ;;  %vm2295_vm5 = vcmp.lt.s32.totalorder %v2291_v29, 14  ;;  %vm2760_vm10 = vcmp.lt.s32.totalorder %v2756_v34, 14  ;;  %vm988_vm13 = vcmp.ge.s32.totalorder %v986_v21, 0 }
  0x76   : > { %4605 = vmatprep.subr.msk.bf16.mxu0 %vm630_vm1, %v6227_v25  ;;  %v5438_v25 = vld [vmem:[%s7834_s4 + $0xcc] ss:$16 sps:$4 sm:$0xff]   ;;  %vm1836_vm6 = vmpackc.low %vm1828_vm3, %vm1828_vm3  ;;  %vm1819_vm1 = vsmask.f32 256  ;;  %vm2285_vm3 = vcmask 1047552  }
  0x77   : > { %1403 = vmatprep.subr.bf16.mxu1 %v5438_v25  ;;  %vm2303_vm9 = vmpackc.low %vm2295_vm5, %vm2295_vm5  ;;  %vm2748_vm5 = vcmask 1046528   ;;  %v5495_v21 = vld [vmem:[%s7834_s4 + $0x3c4] ss:$16 sps:$4 sm:$0xff]  }
  0x78   : > { %1404 = vmatpush1.bf16.msra.mxu1 %v5436_v28  ;;  %vm2768_vm11 = vmpackc.low %vm2760_vm10, %vm2760_vm10 }
  0x79   : > { %760 = vmatpush1.bf16.msra.mxu0 %v632_v32  ;;  %v5442_v32 = vld [vmem:[%s7834_s4 + $0xe8] ss:$16 sps:$4 sm:$0xff]   ;;  %1405 = vmatprep.subr.bf16.mxu1 %v5444_v33  ;;  %vm998_vm14 = vmpackc.low %vm988_vm13, %vm988_vm13 }
  0x7a   : > { %1348 = vmatprep.subr.bf16.mxu0 %v5399_v43  ;;  %vm6553_vm7 = vmand %vm978_vm15, %vm1819_vm1 }
  0x7c   : > { %776 = vmatmul.mubr.bf16.vlgmr.msra.gmra.mrb[8].mxu0 %v5394_v41  ;;  %1406 = vmatpush1.bf16.msra.mxu1 %v5442_v32  ;;  %v5456_v41 = vld [vmem:[%s7834_s4 + $0x12c] ss:$16 sps:$4 sm:$0xff]  }
  0x7d   : > { %1349 = vmatpush1.bf16.msra.mxu0 %v5397_v42  ;;  %1407 = vmatprep.subr.bf16.mxu1 %v5450_v36  ;;  %v5982_v42 = vmov 0  }
  0x7e   : > { %1350 = vmatprep.subr.bf16.mxu0 %v5405_v46  ;;  %v6434_v43 = vsel %vm6415_vm4, 65537, %v5982_v42  ;;  %v6437_v44 = vsel %vm1836_vm6, 65537, %v5982_v42  ;;  %v6440_v45 = vsel %vm999_vm8, 65537, %v5982_v42  ;;  %v6445_v47 = vsel %vm2303_vm9, 65537, %v5982_v42 }
  0x7f   : > { %v4784_v46 = vcombine.low %v6434_v43, %v6437_v44  ;;  %v4901_v49 = vcombine.low %v6440_v45, %v6445_v47  ;;  %vm2286_vm4 = vsmask.f32 7424  ;;  %v872_v47 = vsub.s32 0, %v6351_v3 }
  0x80   : > { %1408 = vmatpush1.bf16.msra.mxu1 %v5448_v39  ;;  %vm6566_vm9 = vmand %vm2285_vm3, %vm2286_vm4 }
  0x81   : > { %1351 = vmatpush1.bf16.msra.mxu0 %v5403_v48  ;;  %v5451_v48 = vld [vmem:[%s7834_s4 + $0x120] ss:$16 sps:$4 sm:$0xff]   ;;  %1409 = vmatprep.subr.bf16.mxu1 %v5456_v41  ;;  %vm6562_vm8 = vcmp.ne.s16.totalorder %v4784_v46, 0  ;;  %vm6574_vm10 = vcmp.ne.s16.totalorder %v4901_v49, 0 }
  0x82   : > { %1352 = vmatprep.subr.bf16.mxu0 %v5411_v58 }
  0x85   : > { %1353 = vmatpush1.bf16.msra.mxu0 %v5409_v60  ;;  %v5460_v60 = vld [vmem:[%s7834_s4 + $0x148] ss:$16 sps:$4 sm:$0xff]  }
  0x86   : > { %1354 = vmatprep.subr.bf16.mxu0 %v5417_v63  ;;  %v5463_v63 = vld [vmem:[%s7834_s4 + $0x160] ss:$16 sps:$4 sm:$0xff]  }
  0x89   : > { %1355 = vmatpush1.bf16.msra.mxu0 %v5415_v1  ;;  %v5471_v1 = vld [vmem:[%s7834_s4 + $0x184] ss:$16 sps:$4 sm:$0xff]  }
  0x8a   : > { %1356 = vmatprep.subr.bf16.mxu0 %v5423_v4  ;;  %v5469_v4 = vld [vmem:[%s7834_s4 + $0x180] ss:$16 sps:$4 sm:$0xff]  }
  0x8d   : > { %1357 = vmatpush1.bf16.msra.mxu0 %v5421_v6  ;;  %v5477_v6 = vld [vmem:[%s7834_s4 + $0x1a4] ss:$16 sps:$4 sm:$0xff]  }
  0x8e   : > { %1358 = vmatprep.subr.bf16.mxu0 %v5429_v14  ;;  %v5486_v14 = vld [vmem:[%s7834_s4 + $0x38c] ss:$16 sps:$4 sm:$0xff]  }
  0x91   : > { %1359 = vmatpush1.bf16.msra.mxu0 %v5427_v19 }
  0x92   : > { %1360 = vmatprep.subr.bf16.mxu0 %v5435_v23  ;;  %v868_v23 = vld [vmem:[%s7833_s3] sm:$0x3] }
  0x93   : > { %v873_v49 = vrot.slane %v868_v23, %v872_v47 }
  0x95   : > { %1361 = vmatpush1.bf16.msra.mxu0 %v5433_v24 }
  0x96   : > { %1362 = vmatprep.subr.bf16.mxu0 %v5441_v31  ;;  %v1000_v31 = vsel %vm998_vm14, 65537, %v5982_v42 }
  0x97   : > { %v4665_v33 = vcombine.low %v1000_v31, %v6440_v45  ;;  %v5513_v31 = vld [vmem:[%s7834_s4 + $0x424] ss:$16 sps:$4 sm:$0xff]  }
  0x99   : > { %1363 = vmatpush1.bf16.msra.mxu0 %v5439_v30  ;;  %vm6538_vm0 = vcmp.ne.s16.totalorder %v4665_v33, 0  ;;  %v5511_v33 = vld [vmem:[%s7834_s4 + $0x420] ss:$16 sps:$4 sm:$0xff]  }
  0x9a   : > { %1364 = vmatprep.subr.bf16.mxu0 %v5447_v35 }
  0x9d   : > { %1365 = vmatpush1.bf16.msra.mxu0 %v5445_v38 }
  0x9e   : > { %1366 = vmatprep.subr.bf16.mxu0 %v5453_v40 }
  0xa1   : > { %1367 = vmatpush1.bf16.msra.mxu0 %v5451_v48 }
 0x107   : > { %v6319_v50 = vpop.f32.mrb[0].mxu0 }
 0x108   : > { %v6321_v51 = vpop.f32.mrb[1].mxu0 }
 0x109   : > { %v6323_v52 = vpop.f32.mrb[2].mxu0 }
 0x10a   : > { %v6325_v53 = vpop.f32.mrb[3].mxu0 }
 0x10c   : > { %v820_v54 = vpop.f32.mrb[0].mxu1 }
 0x10d   : > { %v822_v55 = vpop.f32.mrb[1].mxu1 }
 0x10e   : > { %v824_v56 = vpop.f32.mrb[2].mxu1 }
 0x10f   : > { %v826_v57 = vpop.f32.mrb[3].mxu1 }
 0x12b   : > { %v720_v9 = vpop.f32.mrb[4].mxu0 }
 0x12c   : > { %v831_v10 = vmax.f32 %v720_v9, %v820_v54  ;;  %v722_v11 = vpop.f32.mrb[5].mxu0  ;;  %v5454_v54 = vld [vmem:[%s7834_s4 + $0x128] ss:$16 sps:$4 sm:$0xff]  }
 0x12d   : > { %v832_v12 = vmax.f32 %v722_v11, %v822_v55  ;;  %v724_v13 = vpop.f32.mrb[6].mxu0  ;;  %v5459_v55 = vld [vmem:[%s7834_s4 + $0x144] ss:$16 sps:$4 sm:$0xff]   ;;  %1410 = vmatpush1.bf16.msra.mxu1 %v5454_v54  ;;  %v5478_v9 = vld [vmem:[%s7834_s4 + $0x1a8] ss:$16 sps:$4 sm:$0xff]  }
 0x12e   : > { %v835_v17 = vmax.f32 %v724_v13, %v824_v56  ;;  %845 = vrot.lane.b32.xlu0 %v831_v10, %s5980_s25  ;;  %v726_v18 = vpop.f32.mrb[7].mxu0  ;;  %v6459_v56 = vsel %vm2768_vm11, 65537, %v5982_v42  ;;  %1368 = vmatprep.subr.bf16.mxu0 %v5459_v55  ;;  %v5483_v11 = vld [vmem:[%s7834_s4 + $0x384] ss:$16 sps:$4 sm:$0xff]   ;;  %vm3250_vm11 = vcmask 130048  }
 0x12f   : > { %v836_v22 = vmax.f32 %v726_v18, %v826_v57  ;;  %v5462_v57 = vld [vmem:[%s7834_s4 + $0x14c] ss:$16 sps:$4 sm:$0xff]   ;;  %v5018_v58 = vcombine.low %v6440_v45, %v6459_v56  ;;  %1369 = vmatpush1.bf16.msra.mxu0 %v5457_v59  ;;  %v5655_v59 = vld [vmem:[%s7834_s4 + $0x560] ss:$16 sps:$4 sm:$0xff]  }
 0x130   : > { %851 = vrot.lane.b32.xlu1 %v835_v17, %s5980_s25  ;;  %1411 = vmatprep.subr.bf16.mxu1 %v5462_v57  ;;  %v5666_v56 = vld [vmem:[%s7834_s4 + $0x58c] ss:$16 sps:$4 sm:$0xff]   ;;  %v5818_v55 = vld [vmem:[%s7837_s7] sm:$0xff]  }
 0x131   : > { %1412 = vmatpush1.bf16.msra.mxu1 %v5460_v60  ;;  %1370 = vmatprep.subr.bf16.mxu0 %v5465_v61  ;;  %vm6546_vm6 = vcmp.ne.s16.totalorder %v5018_v58, 0  ;;  %v5739_v58 = vld [vmem:[%s7834_s4 + $0x720] ss:$16 sps:$4 sm:$0xff]  }
 0x132   : > { %847 = vrot.lane.b32.xlu0 %v832_v12, %s5980_s25  ;;  %1413 = vmatprep.subr.bf16.mxu1 %v5468_v62 }
 0x133   : > { %1371 = vmatpush1.bf16.msra.mxu0 %v5463_v63 }
 0x134   : > { %853 = vrot.lane.b32.xlu1 %v836_v22, %s5980_s25  ;;  %1372 = vmatprep.subr.bf16.mxu0 %v5471_v1 }
 0x135   : > { %1414 = vmatpush1.bf16.msra.mxu1 %v5466_v0  ;;  %v5750_v0 = vld [vmem:[%s7834_s4 + $0x74c] ss:$16 sps:$4 sm:$0xff]  }
 0x136   : > { %1415 = vmatprep.subr.bf16.mxu1 %v5474_v2 }
 0x137   : > { %1373 = vmatpush1.bf16.msra.mxu0 %v5469_v4 }
 0x138   : > { %1374 = vmatprep.subr.bf16.mxu0 %v5477_v6 }
 0x139   : > { %1416 = vmatpush1.bf16.msra.mxu1 %v5472_v5 }
 0x13a   : > { %1417 = vmatprep.subr.bf16.mxu1 %v5480_v7 }
 0x13b   : > { %1375 = vmatpush1.bf16.msra.mxu0 %v5475_v8 }
 0x13c   : > { %1717 = vmatprep.subr.bf16.mxu0 %v5483_v11 }
 0x13d   : > { %1418 = vmatpush1.bf16.msra.mxu1 %v5478_v9 }
 0x13e   : > { %1760 = vmatprep.subr.bf16.mxu1 %v5486_v14 }
 0x14f   : > { %v6508_v10 = vpop.f32.mrb[8].mxu0 }
 0x150   : > { %v829_v12 = vmax.f32 %v6319_v50, %v6508_v10  ;;  %v779_v13 = vpop.f32.mrb[9].mxu0  ;;  %v5484_v50 = vld [vmem:[%s7834_s4 + $0x388] ss:$16 sps:$4 sm:$0xff]  }
 0x151   : > { %v830_v15 = vmax.f32 %v6321_v51, %v779_v13  ;;  %v6519_v17 = vpop.f32.mrb[10].mxu0  ;;  %v876_v51 = vsub.s32 1, %v6351_v3  ;;  %v5846_v3 = vld [vmem:[%s7837_s7 + $0x150] sm:$0xff]  }
 0x152   : > { %v833_v18 = vmax.f32 %v6323_v52, %v6519_v17  ;;  %v783_v19 = vpop.f32.mrb[11].mxu0  ;;  %v5489_v52 = vld [vmem:[%s7834_s4 + $0x3a4] ss:$16 sps:$4 sm:$0xff]   ;;  %v5492_v17 = vld [vmem:[%s7834_s4 + $0x3ac] ss:$16 sps:$4 sm:$0xff]  }
 0x153   : > { %v834_v20 = vmax.f32 %v6325_v53, %v783_v19  ;;  %843 = vrot.lane.b32.xlu0 %v830_v15, %s5980_s25  ;;  %v877_v53 = vrot.slane %v868_v23, %v876_v51  ;;  %v5481_v19 = vld [vmem:[%s7834_s4 + $0x380] ss:$16 sps:$4 sm:$0xff]  }
 0x154   : > { %v5493_v23 = vld [vmem:[%s7834_s4 + $0x3c0] ss:$16 sps:$4 sm:$0xff]  }
 0x155   : > { %849 = vrot.lane.b32.xlu1 %v834_v20, %s5980_s25 }
 0x1a0   : > { %v846_v22 = vpop.permute.xlu0 %845 }
 0x1a2   : > { %v852_v24 = vpop.permute.xlu1 %851 }
 0x1a4   : > { %v848_v25 = vpop.permute.xlu0 %847 }
 0x1a5   : > { %v857_v26 = vsel %vm855_vm12, %v846_v22, %v848_v25  ;;  %v5504_v25 = vld [vmem:[%s7834_s4 + $0x3ec] ss:$16 sps:$4 sm:$0xff]  }
 0x1a6   : > { %v865_v27 = vmax.f32 %v830_v15, %v857_v26  ;;  %v854_v28 = vpop.permute.xlu1 %853  ;;  %v5499_v26 = vld [vmem:[%s7834_s4 + $0x3e0] ss:$16 sps:$4 sm:$0xff]  }
 0x1a7   : > { %v859_v16 = vsel %vm855_vm12, %v852_v24, %v854_v28  ;;  %v5507_v28 = vld [vmem:[%s7834_s4 + $0x404] ss:$16 sps:$4 sm:$0xff]  }
 0x1a8   : > { %v881_v29 = vadd.f32 %v877_v53, %v865_v27  ;;  %v867_v30 = vmax.f32 %v834_v20, %v859_v16  ;;  %v5490_v20 = vld [vmem:[%s7834_s4 + $0x3a8] ss:$16 sps:$4 sm:$0xff]   ;;  %v5510_v16 = vld [vmem:[%s7834_s4 + $0x40c] ss:$16 sps:$4 sm:$0xff]  }
 0x1a9   : > { %v5502_v27 = vld [vmem:[%s7834_s4 + $0x3e8] ss:$16 sps:$4 sm:$0xff]  }
 0x1aa   : > { %v883_v32 = vadd.f32 %v877_v53, %v867_v30  ;;  %v885_v34 = vmax.f32 %v881_v29, 0.0  ;;  %v5501_v53 = vld [vmem:[%s7834_s4 + $0x3e4] ss:$16 sps:$4 sm:$0xff]   ;;  %v5505_v29 = vld [vmem:[%s7834_s4 + $0x400] ss:$16 sps:$4 sm:$0xff]  }
 0x1ab   : > { %v5508_v30 = vld [vmem:[%s7834_s4 + $0x408] ss:$16 sps:$4 sm:$0xff]  }
 0x1ac   : > { %v887_v35 = vmax.f32 %v883_v32, 0.0  ;;  %v5516_v32 = vld [vmem:[%s7834_s4 + $0x42c] ss:$16 sps:$4 sm:$0xff]  }
 0x1ae   : > { %v889_v36 = vpack.c.bf16 %v887_v35, %v885_v34  ;;  %v5514_v34 = vld [vmem:[%s7834_s4 + $0x428] ss:$16 sps:$4 sm:$0xff]   ;;  %v5519_v35 = vld [vmem:[%s7834_s4 + $0x444] ss:$16 sps:$4 sm:$0xff]  }
 0x1b0   : > { %v977_v38 = vrot.slane %v889_v36, 7  ;;  %v1810_v39 = vshrl.u32 %v889_v36, 16  ;;  %v1813_v40 = vshll.u32 %v889_v36, 16  ;;  %v2747_v41 = vrot.slane %v889_v36, 1 }
 0x1b2   : > { %v984_v48 = vsel %vm978_vm15, 0, %v977_v38  ;;  %v1812_v54 = vrot.slane %v1810_v39, 7  ;;  %v2281_v60 = vrot.slane %v1813_v40, 1  ;;  %v2753_v62 = vsel %vm2748_vm5, %v2747_v41, 0  ;;  %v5520_v38 = vld [vmem:[%s7834_s4 + $0x448] ss:$16 sps:$4 sm:$0xff]  }
 0x1b3   : > { %v1007_v57 = vsel %vm6538_vm0, %v984_v48, 0  ;;  %v6580_v43 = vsel %vm6546_vm6, %v2753_v62, 0  ;;  %v5523_v41 = vld [vmem:[%s7834_s4 + $0x460] ss:$16 sps:$4 sm:$0xff]   ;;  %v5526_v48 = vld [vmem:[%s7834_s4 + $0x468] ss:$16 sps:$4 sm:$0xff]  }
 0x1b4   : > { %4722 = vmatprep.mubr.msk.bf16.mxu0 %vm1344_vm2, %v1007_v57  ;;  %4724 = vmatprep.mubr.msk.bf16.mxu1 %vm1344_vm2, %v1007_v57  ;;  %v1815_v61 = vor.u32 %v1813_v40, %v1812_v54  ;;  %v2282_v63 = vor.u32 %v2281_v60, %v1810_v39  ;;  %v5525_v39 = vld [vmem:[%s7834_s4 + $0x464] ss:$16 sps:$4 sm:$0xff]   ;;  %v5528_v40 = vld [vmem:[%s7834_s4 + $0x46c] ss:$16 sps:$4 sm:$0xff]   ;;  %v5529_v60 = vld [vmem:[%s7834_s4 + $0x480] ss:$16 sps:$4 sm:$0xff]  }
 0x1b5   : > { %v5531_v54 = vld [vmem:[%s7834_s4 + $0x484] ss:$16 sps:$4 sm:$0xff]   ;;  %v5534_v57 = vld [vmem:[%s7834_s4 + $0x48c] ss:$16 sps:$4 sm:$0xff]  }
 0x1b6   : > { %v1822_v44 = vsel %vm6553_vm7, 0, %v1815_v61  ;;  %v2289_v1 = vsel %vm6566_vm9, %v2282_v63, 0  ;;  %v5532_v61 = vld [vmem:[%s7834_s4 + $0x488] ss:$16 sps:$4 sm:$0xff]   ;;  %v5537_v62 = vld [vmem:[%s7834_s4 + $0x4a4] ss:$16 sps:$4 sm:$0xff]  }
 0x1b7   : > { %v6586_v46 = vsel %vm6562_vm8, %v1822_v44, 0  ;;  %v6592_v45 = vsel %vm6574_vm10, %v2289_v1, 0  ;;  %v5540_v63 = vld [vmem:[%s7834_s4 + $0x4ac] ss:$16 sps:$4 sm:$0xff]   ;;  %v5535_v44 = vld [vmem:[%s7834_s4 + $0x4a0] ss:$16 sps:$4 sm:$0xff]  }
 0x1b8   : > { %v5538_v1 = vld [vmem:[%s7834_s4 + $0x4a8] ss:$16 sps:$4 sm:$0xff]  }
 0x1c5   : > { %v844_v2 = vpop.permute.xlu0 %843 }
 0x1c6   : > { %v856_v4 = vsel %vm855_vm12, %v844_v2, %v846_v22  ;;  %v5498_v22 = vld [vmem:[%s7834_s4 + $0x3cc] ss:$16 sps:$4 sm:$0xff]  }
 0x1c7   : > { %v864_v5 = vmax.f32 %v829_v12, %v856_v4  ;;  %v850_v6 = vpop.permute.xlu1 %849  ;;  %v5546_v2 = vld [vmem:[%s7834_s4 + $0x4cc] ss:$16 sps:$4 sm:$0xff]   ;;  %v5541_v4 = vld [vmem:[%s7834_s4 + $0x4c0] ss:$16 sps:$4 sm:$0xff]  }
 0x1c8   : > { %v858_v7 = vsel %vm855_vm12, %v850_v6, %v852_v24  ;;  %v5496_v24 = vld [vmem:[%s7834_s4 + $0x3c8] ss:$16 sps:$4 sm:$0xff]   ;;  %v5549_v6 = vld [vmem:[%s7834_s4 + $0x4e4] ss:$16 sps:$4 sm:$0xff]  }
 0x1c9   : > { %v880_v8 = vadd.f32 %v873_v49, %v864_v5  ;;  %v866_v9 = vmax.f32 %v833_v18, %v858_v7  ;;  %v5487_v18 = vld [vmem:[%s7834_s4 + $0x3a0] ss:$16 sps:$4 sm:$0xff]   ;;  %v5544_v5 = vld [vmem:[%s7834_s4 + $0x4c8] ss:$16 sps:$4 sm:$0xff]   ;;  %v5552_v7 = vld [vmem:[%s7834_s4 + $0x4ec] ss:$16 sps:$4 sm:$0xff]  }
 0x1cb   : > { %v882_v11 = vadd.f32 %v873_v49, %v866_v9  ;;  %v884_v13 = vmax.f32 %v880_v8, 0.0  ;;  %v5543_v49 = vld [vmem:[%s7834_s4 + $0x4c4] ss:$16 sps:$4 sm:$0xff]   ;;  %v5547_v8 = vld [vmem:[%s7834_s4 + $0x4e0] ss:$16 sps:$4 sm:$0xff]  }
 0x1cc   : > { %v5550_v9 = vld [vmem:[%s7834_s4 + $0x4e8] ss:$16 sps:$4 sm:$0xff]  }
 0x1cd   : > { %v886_v14 = vmax.f32 %v882_v11, 0.0  ;;  %v5555_v11 = vld [vmem:[%s7834_s4 + $0x504] ss:$16 sps:$4 sm:$0xff]  }
 0x1cf   : > { %v6605_v15 = vpack.c.bf16 %v886_v14, %v884_v13  ;;  %v5558_v13 = vld [vmem:[%s7834_s4 + $0x50c] ss:$16 sps:$4 sm:$0xff]   ;;  %v5553_v14 = vld [vmem:[%s7834_s4 + $0x500] ss:$16 sps:$4 sm:$0xff]  }
 0x1d1   : > { %v976_v10 = vrot.slane %v6605_v15, 7 }
 0x1d3   : > { %v981_v12 = vsel %vm978_vm15, 0, %v976_v10  ;;  %v5564_v10 = vld [vmem:[%s7834_s4 + $0x52c] ss:$16 sps:$4 sm:$0xff]  }
 0x1d4   : > { %4723 = vmatmul.mubr.msk.bf16.vlgmr.msra.gmra.mrb[12].mxu0 %vm6538_vm0, %v981_v12  ;;  %4725 = vmatmul.mubr.msk.bf16.vlgmr.msra.gmra.mrb[4].mxu1 %vm6538_vm0, %v981_v12  ;;  %v5559_v12 = vld [vmem:[%s7834_s4 + $0x520] ss:$16 sps:$4 sm:$0xff]  }
 0x1d5   : > { %1718 = vmatpush1.bf16.msra.mxu0 %v5481_v19  ;;  %1761 = vmatpush1.bf16.msra.mxu1 %v5484_v50  ;;  %v5556_v19 = vld [vmem:[%s7834_s4 + $0x508] ss:$16 sps:$4 sm:$0xff]   ;;  %v5561_v50 = vld [vmem:[%s7834_s4 + $0x524] ss:$16 sps:$4 sm:$0xff]  }
 0x1d6   : > { %4782 = vmatprep.mubr.msk.bf16.mxu0 %vm1344_vm2, %v889_v36  ;;  %4783 = vmatprep.mubr.msk.bf16.mxu1 %vm1344_vm2, %v889_v36  ;;  %v5522_v36 = vld [vmem:[%s7834_s4 + $0x44c] ss:$16 sps:$4 sm:$0xff]  }
 0x1d7   : > { %1719 = vmatprep.subr.bf16.mxu0 %v5489_v52  ;;  %1762 = vmatprep.subr.bf16.mxu1 %v5492_v17  ;;  %v5562_v52 = vld [vmem:[%s7834_s4 + $0x528] ss:$16 sps:$4 sm:$0xff]   ;;  %v5567_v17 = vld [vmem:[%s7834_s4 + $0x1c4] ss:$16 sps:$4 sm:$0xff]  }
 0x1d9   : > { %1720 = vmatpush1.bf16.msra.mxu0 %v5487_v18  ;;  %1763 = vmatpush1.bf16.msra.mxu1 %v5490_v20  ;;  %v5570_v18 = vld [vmem:[%s7834_s4 + $0x1cc] ss:$16 sps:$4 sm:$0xff]   ;;  %v5565_v20 = vld [vmem:[%s7834_s4 + $0x1c0] ss:$16 sps:$4 sm:$0xff]  }
 0x1da   : > { %1721 = vmatprep.subr.bf16.mxu0 %v5495_v21  ;;  %1764 = vmatprep.subr.bf16.mxu1 %v5498_v22  ;;  %v5568_v21 = vld [vmem:[%s7834_s4 + $0x1c8] ss:$16 sps:$4 sm:$0xff]   ;;  %v5573_v22 = vld [vmem:[%s7834_s4 + $0x1e4] ss:$16 sps:$4 sm:$0xff]  }
 0x1dd   : > { %1722 = vmatpush1.bf16.msra.mxu0 %v5493_v23  ;;  %1765 = vmatpush1.bf16.msra.mxu1 %v5496_v24  ;;  %v5576_v23 = vld [vmem:[%s7834_s4 + $0x1ec] ss:$16 sps:$4 sm:$0xff]   ;;  %v5571_v24 = vld [vmem:[%s7834_s4 + $0x1e0] ss:$16 sps:$4 sm:$0xff]  }
 0x1de   : > { %1723 = vmatprep.subr.bf16.mxu0 %v5501_v53  ;;  %1766 = vmatprep.subr.bf16.mxu1 %v5504_v25  ;;  %v5574_v53 = vld [vmem:[%s7834_s4 + $0x1e8] ss:$16 sps:$4 sm:$0xff]   ;;  %v5579_v25 = vld [vmem:[%s7834_s4 + $0x204] ss:$16 sps:$4 sm:$0xff]  }
 0x1e1   : > { %1724 = vmatpush1.bf16.msra.mxu0 %v5499_v26  ;;  %1767 = vmatpush1.bf16.msra.mxu1 %v5502_v27  ;;  %v5582_v26 = vld [vmem:[%s7834_s4 + $0x20c] ss:$16 sps:$4 sm:$0xff]   ;;  %v5577_v27 = vld [vmem:[%s7834_s4 + $0x200] ss:$16 sps:$4 sm:$0xff]  }
 0x1e2   : > { %1725 = vmatprep.subr.bf16.mxu0 %v5507_v28  ;;  %1768 = vmatprep.subr.bf16.mxu1 %v5510_v16  ;;  %v5585_v28 = vld [vmem:[%s7834_s4 + $0x224] ss:$16 sps:$4 sm:$0xff]   ;;  %v5588_v16 = vld [vmem:[%s7834_s4 + $0x22c] ss:$16 sps:$4 sm:$0xff]  }
 0x1e5   : > { %1726 = vmatpush1.bf16.msra.mxu0 %v5505_v29  ;;  %1769 = vmatpush1.bf16.msra.mxu1 %v5508_v30  ;;  %v5583_v29 = vld [vmem:[%s7834_s4 + $0x220] ss:$16 sps:$4 sm:$0xff]   ;;  %v5586_v30 = vld [vmem:[%s7834_s4 + $0x228] ss:$16 sps:$4 sm:$0xff]  }
 0x1e6   : > { %1727 = vmatprep.subr.bf16.mxu0 %v5513_v31  ;;  %1770 = vmatprep.subr.bf16.mxu1 %v5516_v32  ;;  %v5591_v31 = vld [vmem:[%s7834_s4 + $0x244] ss:$16 sps:$4 sm:$0xff]   ;;  %v5594_v32 = vld [vmem:[%s7834_s4 + $0x24c] ss:$16 sps:$4 sm:$0xff]  }
 0x1e9   : > { %1728 = vmatpush1.bf16.msra.mxu0 %v5511_v33  ;;  %1771 = vmatpush1.bf16.msra.mxu1 %v5514_v34  ;;  %v5589_v33 = vld [vmem:[%s7834_s4 + $0x240] ss:$16 sps:$4 sm:$0xff]   ;;  %v5592_v34 = vld [vmem:[%s7834_s4 + $0x248] ss:$16 sps:$4 sm:$0xff]  }
 0x1ea   : > { %1729 = vmatprep.subr.bf16.mxu0 %v5519_v35  ;;  %1772 = vmatprep.subr.bf16.mxu1 %v5522_v36  ;;  %v5597_v35 = vld [vmem:[%s7834_s4 + $0x264] ss:$16 sps:$4 sm:$0xff]   ;;  %v5600_v36 = vld [vmem:[%s7834_s4 + $0x26c] ss:$16 sps:$4 sm:$0xff]  }
 0x1ed   : > { %1730 = vmatpush1.bf16.msra.mxu0 %v5517_v37  ;;  %1773 = vmatpush1.bf16.msra.mxu1 %v5520_v38  ;;  %v5595_v37 = vld [vmem:[%s7834_s4 + $0x260] ss:$16 sps:$4 sm:$0xff]   ;;  %v5598_v38 = vld [vmem:[%s7834_s4 + $0x268] ss:$16 sps:$4 sm:$0xff]  }
 0x1ee   : > { %1731 = vmatprep.subr.bf16.mxu0 %v5525_v39  ;;  %1774 = vmatprep.subr.bf16.mxu1 %v5528_v40  ;;  %v5603_v39 = vld [vmem:[%s7834_s4 + $0x284] ss:$16 sps:$4 sm:$0xff]   ;;  %v5606_v40 = vld [vmem:[%s7834_s4 + $0x28c] ss:$16 sps:$4 sm:$0xff]  }
 0x1f1   : > { %1732 = vmatpush1.bf16.msra.mxu0 %v5523_v41  ;;  %1775 = vmatpush1.bf16.msra.mxu1 %v5526_v48  ;;  %v5601_v41 = vld [vmem:[%s7834_s4 + $0x280] ss:$16 sps:$4 sm:$0xff]   ;;  %v5604_v48 = vld [vmem:[%s7834_s4 + $0x288] ss:$16 sps:$4 sm:$0xff]  }
 0x1f2   : > { %1733 = vmatprep.subr.bf16.mxu0 %v5531_v54  ;;  %1776 = vmatprep.subr.bf16.mxu1 %v5534_v57  ;;  %v5609_v54 = vld [vmem:[%s7834_s4 + $0x2a4] ss:$16 sps:$4 sm:$0xff]   ;;  %v5612_v57 = vld [vmem:[%s7834_s4 + $0x2ac] ss:$16 sps:$4 sm:$0xff]  }
 0x1f5   : > { %1734 = vmatpush1.bf16.msra.mxu0 %v5529_v60  ;;  %1777 = vmatpush1.bf16.msra.mxu1 %v5532_v61  ;;  %v5607_v60 = vld [vmem:[%s7834_s4 + $0x2a0] ss:$16 sps:$4 sm:$0xff]   ;;  %v5610_v61 = vld [vmem:[%s7834_s4 + $0x2a8] ss:$16 sps:$4 sm:$0xff]  }
 0x1f6   : > { %1735 = vmatprep.subr.bf16.mxu0 %v5537_v62  ;;  %1778 = vmatprep.subr.bf16.mxu1 %v5540_v63  ;;  %v5615_v62 = vld [vmem:[%s7834_s4 + $0x2c4] ss:$16 sps:$4 sm:$0xff]   ;;  %v5618_v63 = vld [vmem:[%s7834_s4 + $0x2cc] ss:$16 sps:$4 sm:$0xff]  }
 0x1f9   : > { %1736 = vmatpush1.bf16.msra.mxu0 %v5535_v44  ;;  %1779 = vmatpush1.bf16.msra.mxu1 %v5538_v1  ;;  %v5613_v44 = vld [vmem:[%s7834_s4 + $0x2c0] ss:$16 sps:$4 sm:$0xff]   ;;  %v5616_v1 = vld [vmem:[%s7834_s4 + $0x2c8] ss:$16 sps:$4 sm:$0xff]  }
 0x1fa   : > { %1737 = vmatprep.subr.bf16.mxu0 %v5543_v49  ;;  %1780 = vmatprep.subr.bf16.mxu1 %v5546_v2  ;;  %v5621_v49 = vld [vmem:[%s7834_s4 + $0x2e4] ss:$16 sps:$4 sm:$0xff]   ;;  %v5624_v2 = vld [vmem:[%s7834_s4 + $0x2ec] ss:$16 sps:$4 sm:$0xff]  }
 0x1fd   : > { %1738 = vmatpush1.bf16.msra.mxu0 %v5541_v4  ;;  %1781 = vmatpush1.bf16.msra.mxu1 %v5544_v5  ;;  %v5619_v4 = vld [vmem:[%s7834_s4 + $0x2e0] ss:$16 sps:$4 sm:$0xff]   ;;  %v5622_v5 = vld [vmem:[%s7834_s4 + $0x2e8] ss:$16 sps:$4 sm:$0xff]  }
 0x1fe   : > { %1739 = vmatprep.subr.bf16.mxu0 %v5549_v6  ;;  %1782 = vmatprep.subr.bf16.mxu1 %v5552_v7  ;;  %v5627_v6 = vld [vmem:[%s7834_s4 + $0x304] ss:$16 sps:$4 sm:$0xff]   ;;  %v5630_v7 = vld [vmem:[%s7834_s4 + $0x30c] ss:$16 sps:$4 sm:$0xff]  }
 0x201   : > { %1740 = vmatpush1.bf16.msra.mxu0 %v5547_v8  ;;  %1783 = vmatpush1.bf16.msra.mxu1 %v5550_v9  ;;  %v5625_v8 = vld [vmem:[%s7834_s4 + $0x300] ss:$16 sps:$4 sm:$0xff]   ;;  %v5628_v9 = vld [vmem:[%s7834_s4 + $0x308] ss:$16 sps:$4 sm:$0xff]  }
 0x202   : > { %1741 = vmatprep.subr.bf16.mxu0 %v5555_v11  ;;  %1784 = vmatprep.subr.bf16.mxu1 %v5558_v13  ;;  %v5633_v11 = vld [vmem:[%s7834_s4 + $0x324] ss:$16 sps:$4 sm:$0xff]   ;;  %v5636_v13 = vld [vmem:[%s7834_s4 + $0x32c] ss:$16 sps:$4 sm:$0xff]  }
 0x205   : > { %1742 = vmatpush1.bf16.msra.mxu0 %v5553_v14  ;;  %1785 = vmatpush1.bf16.msra.mxu1 %v5556_v19  ;;  %v5631_v14 = vld [vmem:[%s7834_s4 + $0x320] ss:$16 sps:$4 sm:$0xff]   ;;  %v5634_v19 = vld [vmem:[%s7834_s4 + $0x328] ss:$16 sps:$4 sm:$0xff]  }
 0x206   : > { %1743 = vmatprep.subr.bf16.mxu0 %v5561_v50  ;;  %1786 = vmatprep.subr.bf16.mxu1 %v5564_v10  ;;  %v5639_v50 = vld [vmem:[%s7834_s4 + $0x344] ss:$16 sps:$4 sm:$0xff]   ;;  %v5642_v10 = vld [vmem:[%s7834_s4 + $0x34c] ss:$16 sps:$4 sm:$0xff]  }
 0x209   : > { %1744 = vmatpush1.bf16.msra.mxu0 %v5559_v12  ;;  %1787 = vmatpush1.bf16.msra.mxu1 %v5562_v52  ;;  %v1804_v12 = vshrl.u32 %v6605_v15, 16  ;;  %v5637_v52 = vld [vmem:[%s7834_s4 + $0x340] ss:$16 sps:$4 sm:$0xff]  }
 0x20a   : > { %2185 = vmatprep.subr.bf16.mxu0 %v5567_v17  ;;  %2228 = vmatprep.subr.bf16.mxu1 %v5570_v18  ;;  %v5640_v17 = vld [vmem:[%s7834_s4 + $0x348] ss:$16 sps:$4 sm:$0xff]   ;;  %v5645_v18 = vld [vmem:[%s7834_s4 + $0x364] ss:$16 sps:$4 sm:$0xff]  }
 0x20c   : > { %1750 = vmatmul.mubr.bf16.vlgmr.msra.gmra.mrb[12].mxu0 %v6605_v15  ;;  %1793 = vmatmul.mubr.bf16.vlgmr.msra.gmra.mrb[4].mxu1 %v6605_v15 }
 0x20d   : > { %2186 = vmatpush1.bf16.msra.mxu0 %v5565_v20  ;;  %4897 = vmatprep.mubr.msk.bf16.mxu0 %vm1344_vm2, %v6586_v46  ;;  %v5648_v20 = vld [vmem:[%s7834_s4 + $0x36c] ss:$16 sps:$4 sm:$0xff]  }
 0x20e   : > { %2229 = vmatpush1.bf16.msra.mxu1 %v5568_v21  ;;  %4899 = vmatprep.mubr.msk.bf16.mxu1 %vm1344_vm2, %v6586_v46  ;;  %v5580_v46 = vld [vmem:[%s7834_s4 + $0x208] ss:$16 sps:$4 sm:$0xff]   ;;  %v1806_v21 = vrot.slane %v1804_v12, 7 }
 0x20f   : > { %2187 = vmatprep.subr.bf16.mxu0 %v5573_v22  ;;  %2230 = vmatprep.subr.bf16.mxu1 %v5576_v23  ;;  %v5643_v22 = vld [vmem:[%s7834_s4 + $0x360] ss:$16 sps:$4 sm:$0xff]   ;;  %v1807_v23 = vshll.u32 %v6605_v15, 16 }
 0x211   : > { %2188 = vmatpush1.bf16.msra.mxu0 %v5571_v24  ;;  %v5646_v24 = vld [vmem:[%s7834_s4 + $0x368] ss:$16 sps:$4 sm:$0xff]  }
 0x212   : > { %2231 = vmatpush1.bf16.msra.mxu1 %v5574_v53  ;;  %2189 = vmatprep.subr.bf16.mxu0 %v5579_v25  ;;  %v5651_v53 = vld [vmem:[%s7834_s4 + $0x544] ss:$16 sps:$4 sm:$0xff]   ;;  %v1809_v25 = vor.u32 %v1807_v23, %v1806_v21 }
 0x213   : > { %2232 = vmatprep.subr.bf16.mxu1 %v5582_v26  ;;  %v5654_v26 = vld [vmem:[%s7834_s4 + $0x54c] ss:$16 sps:$4 sm:$0xff]   ;;  %v5723_v21 = vld [vmem:[%s7834_s4 + $0x6c4] ss:$16 sps:$4 sm:$0xff]  }
 0x215   : > { %2190 = vmatpush1.bf16.msra.mxu0 %v5577_v27  ;;  %v5649_v27 = vld [vmem:[%s7834_s4 + $0x540] ss:$16 sps:$4 sm:$0xff]  }
 0x216   : > { %2233 = vmatpush1.bf16.msra.mxu1 %v5580_v46  ;;  %2191 = vmatprep.subr.bf16.mxu0 %v5585_v28  ;;  %v5652_v46 = vld [vmem:[%s7834_s4 + $0x548] ss:$16 sps:$4 sm:$0xff]   ;;  %v1821_v28 = vsel %vm6553_vm7, 0, %v1809_v25  ;;  %v5729_v25 = vld [vmem:[%s7834_s4 + $0x6e4] ss:$16 sps:$4 sm:$0xff]  }
 0x217   : > { %2234 = vmatprep.subr.bf16.mxu1 %v5588_v16  ;;  %v5657_v16 = vld [vmem:[%s7834_s4 + $0x564] ss:$16 sps:$4 sm:$0xff]  }
 0x219   : > { %2192 = vmatpush1.bf16.msra.mxu0 %v5583_v29  ;;  %v5660_v29 = vld [vmem:[%s7834_s4 + $0x56c] ss:$16 sps:$4 sm:$0xff]  }
 0x21a   : > { %2235 = vmatpush1.bf16.msra.mxu1 %v5586_v30  ;;  %2193 = vmatprep.subr.bf16.mxu0 %v5591_v31  ;;  %v5658_v30 = vld [vmem:[%s7834_s4 + $0x568] ss:$16 sps:$4 sm:$0xff]   ;;  %v5663_v31 = vld [vmem:[%s7834_s4 + $0x584] ss:$16 sps:$4 sm:$0xff]  }
 0x21b   : > { %2236 = vmatprep.subr.bf16.mxu1 %v5594_v32  ;;  %v5661_v32 = vld [vmem:[%s7834_s4 + $0x580] ss:$16 sps:$4 sm:$0xff]  }
 0x21d   : > { %2194 = vmatpush1.bf16.msra.mxu0 %v5589_v33  ;;  %v5664_v33 = vld [vmem:[%s7834_s4 + $0x588] ss:$16 sps:$4 sm:$0xff]  }
 0x21e   : > { %2237 = vmatpush1.bf16.msra.mxu1 %v5592_v34  ;;  %2195 = vmatprep.subr.bf16.mxu0 %v5597_v35  ;;  %v5672_v34 = vld [vmem:[%s7834_s4 + $0x5ac] ss:$16 sps:$4 sm:$0xff]   ;;  %v5667_v35 = vld [vmem:[%s7834_s4 + $0x5a0] ss:$16 sps:$4 sm:$0xff]  }
 0x21f   : > { %2238 = vmatprep.subr.bf16.mxu1 %v5600_v36  ;;  %v5670_v36 = vld [vmem:[%s7834_s4 + $0x5a8] ss:$16 sps:$4 sm:$0xff]  }
 0x221   : > { %2196 = vmatpush1.bf16.msra.mxu0 %v5595_v37  ;;  %v5675_v37 = vld [vmem:[%s7834_s4 + $0x5c4] ss:$16 sps:$4 sm:$0xff]  }
 0x222   : > { %2239 = vmatpush1.bf16.msra.mxu1 %v5598_v38  ;;  %2197 = vmatprep.subr.bf16.mxu0 %v5603_v39  ;;  %v5678_v38 = vld [vmem:[%s7834_s4 + $0x5cc] ss:$16 sps:$4 sm:$0xff]   ;;  %v5673_v39 = vld [vmem:[%s7834_s4 + $0x5c0] ss:$16 sps:$4 sm:$0xff]  }
 0x223   : > { %2240 = vmatprep.subr.bf16.mxu1 %v5606_v40  ;;  %v5676_v40 = vld [vmem:[%s7834_s4 + $0x5c8] ss:$16 sps:$4 sm:$0xff]  }
 0x225   : > { %2198 = vmatpush1.bf16.msra.mxu0 %v5601_v41  ;;  %v5681_v41 = vld [vmem:[%s7834_s4 + $0x5e4] ss:$16 sps:$4 sm:$0xff]  }
 0x226   : > { %2241 = vmatpush1.bf16.msra.mxu1 %v5604_v48  ;;  %2199 = vmatprep.subr.bf16.mxu0 %v5609_v54  ;;  %v5684_v48 = vld [vmem:[%s7834_s4 + $0x5ec] ss:$16 sps:$4 sm:$0xff]   ;;  %v5679_v54 = vld [vmem:[%s7834_s4 + $0x5e0] ss:$16 sps:$4 sm:$0xff]  }
 0x227   : > { %2242 = vmatprep.subr.bf16.mxu1 %v5612_v57  ;;  %v5682_v57 = vld [vmem:[%s7834_s4 + $0x5e8] ss:$16 sps:$4 sm:$0xff]  }
 0x229   : > { %2200 = vmatpush1.bf16.msra.mxu0 %v5607_v60  ;;  %v5687_v60 = vld [vmem:[%s7834_s4 + $0x604] ss:$16 sps:$4 sm:$0xff]  }
 0x22a   : > { %2243 = vmatpush1.bf16.msra.mxu1 %v5610_v61  ;;  %2201 = vmatprep.subr.bf16.mxu0 %v5615_v62  ;;  %v5690_v61 = vld [vmem:[%s7834_s4 + $0x60c] ss:$16 sps:$4 sm:$0xff]   ;;  %v5685_v62 = vld [vmem:[%s7834_s4 + $0x600] ss:$16 sps:$4 sm:$0xff]  }
 0x22b   : > { %2244 = vmatprep.subr.bf16.mxu1 %v5618_v63  ;;  %v5688_v63 = vld [vmem:[%s7834_s4 + $0x608] ss:$16 sps:$4 sm:$0xff]  }
 0x22d   : > { %2202 = vmatpush1.bf16.msra.mxu0 %v5613_v44  ;;  %v5693_v44 = vld [vmem:[%s7834_s4 + $0x624] ss:$16 sps:$4 sm:$0xff]  }
 0x22e   : > { %2245 = vmatpush1.bf16.msra.mxu1 %v5616_v1  ;;  %2203 = vmatprep.subr.bf16.mxu0 %v5621_v49  ;;  %v5696_v1 = vld [vmem:[%s7834_s4 + $0x62c] ss:$16 sps:$4 sm:$0xff]   ;;  %v5691_v49 = vld [vmem:[%s7834_s4 + $0x620] ss:$16 sps:$4 sm:$0xff]  }
 0x22f   : > { %2246 = vmatprep.subr.bf16.mxu1 %v5624_v2  ;;  %v5694_v2 = vld [vmem:[%s7834_s4 + $0x628] ss:$16 sps:$4 sm:$0xff]  }
 0x231   : > { %2204 = vmatpush1.bf16.msra.mxu0 %v5619_v4  ;;  %v5699_v4 = vld [vmem:[%s7834_s4 + $0x644] ss:$16 sps:$4 sm:$0xff]  }
 0x232   : > { %2247 = vmatpush1.bf16.msra.mxu1 %v5622_v5  ;;  %2205 = vmatprep.subr.bf16.mxu0 %v5627_v6  ;;  %v5702_v5 = vld [vmem:[%s7834_s4 + $0x64c] ss:$16 sps:$4 sm:$0xff]   ;;  %v5697_v6 = vld [vmem:[%s7834_s4 + $0x640] ss:$16 sps:$4 sm:$0xff]  }
 0x233   : > { %2248 = vmatprep.subr.bf16.mxu1 %v5630_v7  ;;  %v5700_v7 = vld [vmem:[%s7834_s4 + $0x648] ss:$16 sps:$4 sm:$0xff]  }
 0x235   : > { %2206 = vmatpush1.bf16.msra.mxu0 %v5625_v8  ;;  %v5705_v8 = vld [vmem:[%s7834_s4 + $0x664] ss:$16 sps:$4 sm:$0xff]  }
 0x236   : > { %2249 = vmatpush1.bf16.msra.mxu1 %v5628_v9  ;;  %2207 = vmatprep.subr.bf16.mxu0 %v5633_v11  ;;  %v5708_v9 = vld [vmem:[%s7834_s4 + $0x66c] ss:$16 sps:$4 sm:$0xff]   ;;  %v5703_v11 = vld [vmem:[%s7834_s4 + $0x660] ss:$16 sps:$4 sm:$0xff]  }
 0x237   : > { %2250 = vmatprep.subr.bf16.mxu1 %v5636_v13  ;;  %v5706_v13 = vld [vmem:[%s7834_s4 + $0x668] ss:$16 sps:$4 sm:$0xff]  }
 0x239   : > { %2208 = vmatpush1.bf16.msra.mxu0 %v5631_v14  ;;  %v5711_v14 = vld [vmem:[%s7834_s4 + $0x684] ss:$16 sps:$4 sm:$0xff]  }
 0x23a   : > { %2251 = vmatpush1.bf16.msra.mxu1 %v5634_v19  ;;  %2209 = vmatprep.subr.bf16.mxu0 %v5639_v50  ;;  %v5714_v19 = vld [vmem:[%s7834_s4 + $0x68c] ss:$16 sps:$4 sm:$0xff]   ;;  %v5709_v50 = vld [vmem:[%s7834_s4 + $0x680] ss:$16 sps:$4 sm:$0xff]  }
 0x23b   : > { %2252 = vmatprep.subr.bf16.mxu1 %v5642_v10  ;;  %v5712_v10 = vld [vmem:[%s7834_s4 + $0x688] ss:$16 sps:$4 sm:$0xff]  }
 0x23d   : > { %2210 = vmatpush1.bf16.msra.mxu0 %v5637_v52  ;;  %v5717_v52 = vld [vmem:[%s7834_s4 + $0x6a4] ss:$16 sps:$4 sm:$0xff]  }
 0x23e   : > { %2253 = vmatpush1.bf16.msra.mxu1 %v5640_v17  ;;  %2211 = vmatprep.subr.bf16.mxu0 %v5645_v18  ;;  %v5720_v17 = vld [vmem:[%s7834_s4 + $0x6ac] ss:$16 sps:$4 sm:$0xff]   ;;  %v5715_v18 = vld [vmem:[%s7834_s4 + $0x6a0] ss:$16 sps:$4 sm:$0xff]  }
 0x23f   : > { %2254 = vmatprep.subr.bf16.mxu1 %v5648_v20  ;;  %v5718_v20 = vld [vmem:[%s7834_s4 + $0x6a8] ss:$16 sps:$4 sm:$0xff]  }
 0x241   : > { %2212 = vmatpush1.bf16.msra.mxu0 %v5643_v22  ;;  %v5726_v22 = vld [vmem:[%s7834_s4 + $0x6cc] ss:$16 sps:$4 sm:$0xff]  }
 0x242   : > { %2255 = vmatpush1.bf16.msra.mxu1 %v5646_v24  ;;  %2652 = vmatprep.subr.bf16.mxu0 %v5651_v53  ;;  %v5721_v24 = vld [vmem:[%s7834_s4 + $0x6c0] ss:$16 sps:$4 sm:$0xff]   ;;  %v5724_v53 = vld [vmem:[%s7834_s4 + $0x6c8] ss:$16 sps:$4 sm:$0xff]  }
 0x243   : > { %2695 = vmatprep.subr.bf16.mxu1 %v5654_v26  ;;  %v5732_v26 = vld [vmem:[%s7834_s4 + $0x6ec] ss:$16 sps:$4 sm:$0xff]  }
 0x244   : > { %4898 = vmatmul.mubr.msk.bf16.vlgmr.msra.gmra.mrb[12].mxu0 %vm6562_vm8, %v1821_v28 }
 0x245   : > { %4900 = vmatmul.mubr.msk.bf16.vlgmr.msra.gmra.mrb[4].mxu1 %vm6562_vm8, %v1821_v28  ;;  %2653 = vmatpush1.bf16.msra.mxu0 %v5649_v27  ;;  %v2279_v27 = vrot.slane %v1807_v23, 1  ;;  %v5730_v28 = vld [vmem:[%s7834_s4 + $0x6e8] ss:$16 sps:$4 sm:$0xff]   ;;  %v5738_v23 = vld [vmem:[%s7834_s4 + $0x70c] ss:$16 sps:$4 sm:$0xff]  }
 0x246   : > { %5014 = vmatprep.mubr.msk.bf16.mxu0 %vm1344_vm2, %v6592_v45  ;;  %2696 = vmatpush1.bf16.msra.mxu1 %v5652_v46  ;;  %v5727_v46 = vld [vmem:[%s7834_s4 + $0x6e0] ss:$16 sps:$4 sm:$0xff]  }
 0x247   : > { %5016 = vmatprep.mubr.msk.bf16.mxu1 %vm1344_vm2, %v6592_v45  ;;  %2654 = vmatprep.subr.bf16.mxu0 %v5657_v16  ;;  %v5669_v45 = vld [vmem:[%s7834_s4 + $0x5a4] ss:$16 sps:$4 sm:$0xff]  }
 0x248   : > { %2697 = vmatprep.subr.bf16.mxu1 %v5660_v29  ;;  %v5735_v16 = vld [vmem:[%s7834_s4 + $0x704] ss:$16 sps:$4 sm:$0xff]   ;;  %v2280_v29 = vor.u32 %v2279_v27, %v1804_v12  ;;  %v5816_v27 = vld [vmem:[%s7834_s4 + $0x8ac] ss:$16 sps:$4 sm:$0xff]  }
 0x249   : > { %2655 = vmatpush1.bf16.msra.mxu0 %v5655_v59  ;;  %v5733_v59 = vld [vmem:[%s7834_s4 + $0x700] ss:$16 sps:$4 sm:$0xff]   ;;  %v5741_v12 = vld [vmem:[%s7834_s4 + $0x724] ss:$16 sps:$4 sm:$0xff]  }
 0x24a   : > { %2698 = vmatpush1.bf16.msra.mxu1 %v5658_v30  ;;  %2656 = vmatprep.subr.bf16.mxu0 %v5663_v31  ;;  %v5736_v30 = vld [vmem:[%s7834_s4 + $0x708] ss:$16 sps:$4 sm:$0xff]   ;;  %v2288_v31 = vsel %vm6566_vm9, %v2280_v29, 0 }
 0x24b   : > { %2699 = vmatprep.subr.bf16.mxu1 %v5666_v56  ;;  %v5744_v56 = vld [vmem:[%s7834_s4 + $0x72c] ss:$16 sps:$4 sm:$0xff]  }
 0x24d   : > { %2657 = vmatpush1.bf16.msra.mxu0 %v5661_v32  ;;  %v5742_v32 = vld [vmem:[%s7834_s4 + $0x728] ss:$16 sps:$4 sm:$0xff]  }
 0x24e   : > { %2700 = vmatpush1.bf16.msra.mxu1 %v5664_v33  ;;  %2658 = vmatprep.subr.bf16.mxu0 %v5669_v45  ;;  %v5747_v33 = vld [vmem:[%s7834_s4 + $0x744] ss:$16 sps:$4 sm:$0xff]   ;;  %v5745_v45 = vld [vmem:[%s7834_s4 + $0x740] ss:$16 sps:$4 sm:$0xff]  }
 0x24f   : > { %2701 = vmatprep.subr.bf16.mxu1 %v5672_v34  ;;  %v5748_v34 = vld [vmem:[%s7834_s4 + $0x748] ss:$16 sps:$4 sm:$0xff]  }
 0x251   : > { %2659 = vmatpush1.bf16.msra.mxu0 %v5667_v35  ;;  %v5756_v35 = vld [vmem:[%s7834_s4 + $0x76c] ss:$16 sps:$4 sm:$0xff]  }
 0x252   : > { %2702 = vmatpush1.bf16.msra.mxu1 %v5670_v36  ;;  %2660 = vmatprep.subr.bf16.mxu0 %v5675_v37  ;;  %v5751_v36 = vld [vmem:[%s7834_s4 + $0x760] ss:$16 sps:$4 sm:$0xff]   ;;  %v5754_v37 = vld [vmem:[%s7834_s4 + $0x768] ss:$16 sps:$4 sm:$0xff]  }
 0x253   : > { %2703 = vmatprep.subr.bf16.mxu1 %v5678_v38  ;;  %v5759_v38 = vld [vmem:[%s7834_s4 + $0x784] ss:$16 sps:$4 sm:$0xff]  }
 0x255   : > { %2661 = vmatpush1.bf16.msra.mxu0 %v5673_v39  ;;  %v5762_v39 = vld [vmem:[%s7834_s4 + $0x78c] ss:$16 sps:$4 sm:$0xff]  }
 0x256   : > { %2704 = vmatpush1.bf16.msra.mxu1 %v5676_v40  ;;  %2662 = vmatprep.subr.bf16.mxu0 %v5681_v41  ;;  %v5757_v40 = vld [vmem:[%s7834_s4 + $0x780] ss:$16 sps:$4 sm:$0xff]   ;;  %v5760_v41 = vld [vmem:[%s7834_s4 + $0x788] ss:$16 sps:$4 sm:$0xff]  }
 0x257   : > { %2705 = vmatprep.subr.bf16.mxu1 %v5684_v48  ;;  %v5765_v48 = vld [vmem:[%s7834_s4 + $0x7a4] ss:$16 sps:$4 sm:$0xff]  }
 0x259   : > { %2663 = vmatpush1.bf16.msra.mxu0 %v5679_v54  ;;  %v5768_v54 = vld [vmem:[%s7834_s4 + $0x7ac] ss:$16 sps:$4 sm:$0xff]  }
 0x25a   : > { %2706 = vmatpush1.bf16.msra.mxu1 %v5682_v57  ;;  %2664 = vmatprep.subr.bf16.mxu0 %v5687_v60  ;;  %v5763_v57 = vld [vmem:[%s7834_s4 + $0x7a0] ss:$16 sps:$4 sm:$0xff]   ;;  %v5766_v60 = vld [vmem:[%s7834_s4 + $0x7a8] ss:$16 sps:$4 sm:$0xff]  }
 0x25b   : > { %2707 = vmatprep.subr.bf16.mxu1 %v5690_v61  ;;  %v5771_v61 = vld [vmem:[%s7834_s4 + $0x7c4] ss:$16 sps:$4 sm:$0xff]  }
 0x25d   : > { %2665 = vmatpush1.bf16.msra.mxu0 %v5685_v62  ;;  %v5774_v62 = vld [vmem:[%s7834_s4 + $0x7cc] ss:$16 sps:$4 sm:$0xff]  }
 0x25e   : > { %2708 = vmatpush1.bf16.msra.mxu1 %v5688_v63  ;;  %2666 = vmatprep.subr.bf16.mxu0 %v5693_v44  ;;  %v5769_v63 = vld [vmem:[%s7834_s4 + $0x7c0] ss:$16 sps:$4 sm:$0xff]   ;;  %v5772_v44 = vld [vmem:[%s7834_s4 + $0x7c8] ss:$16 sps:$4 sm:$0xff]  }
 0x25f   : > { %2709 = vmatprep.subr.bf16.mxu1 %v5696_v1  ;;  %v5777_v1 = vld [vmem:[%s7834_s4 + $0x7e4] ss:$16 sps:$4 sm:$0xff]  }
 0x261   : > { %2667 = vmatpush1.bf16.msra.mxu0 %v5691_v49  ;;  %v5780_v49 = vld [vmem:[%s7834_s4 + $0x7ec] ss:$16 sps:$4 sm:$0xff]  }
 0x262   : > { %2710 = vmatpush1.bf16.msra.mxu1 %v5694_v2  ;;  %2668 = vmatprep.subr.bf16.mxu0 %v5699_v4  ;;  %v5775_v2 = vld [vmem:[%s7834_s4 + $0x7e0] ss:$16 sps:$4 sm:$0xff]   ;;  %v5778_v4 = vld [vmem:[%s7834_s4 + $0x7e8] ss:$16 sps:$4 sm:$0xff]  }
 0x263   : > { %2711 = vmatprep.subr.bf16.mxu1 %v5702_v5  ;;  %v5783_v5 = vld [vmem:[%s7834_s4 + $0x804] ss:$16 sps:$4 sm:$0xff]  }
 0x265   : > { %2669 = vmatpush1.bf16.msra.mxu0 %v5697_v6  ;;  %v5786_v6 = vld [vmem:[%s7834_s4 + $0x80c] ss:$16 sps:$4 sm:$0xff]  }
 0x266   : > { %2712 = vmatpush1.bf16.msra.mxu1 %v5700_v7  ;;  %2670 = vmatprep.subr.bf16.mxu0 %v5705_v8  ;;  %v5781_v7 = vld [vmem:[%s7834_s4 + $0x800] ss:$16 sps:$4 sm:$0xff]   ;;  %v5784_v8 = vld [vmem:[%s7834_s4 + $0x808] ss:$16 sps:$4 sm:$0xff]  }
 0x267   : > { %2713 = vmatprep.subr.bf16.mxu1 %v5708_v9  ;;  %v5789_v9 = vld [vmem:[%s7834_s4 + $0x824] ss:$16 sps:$4 sm:$0xff]  }
 0x269   : > { %2671 = vmatpush1.bf16.msra.mxu0 %v5703_v11  ;;  %v5792_v11 = vld [vmem:[%s7834_s4 + $0x82c] ss:$16 sps:$4 sm:$0xff]  }
 0x26a   : > { %2714 = vmatpush1.bf16.msra.mxu1 %v5706_v13  ;;  %2672 = vmatprep.subr.bf16.mxu0 %v5711_v14  ;;  %v5787_v13 = vld [vmem:[%s7834_s4 + $0x820] ss:$16 sps:$4 sm:$0xff]   ;;  %v5790_v14 = vld [vmem:[%s7834_s4 + $0x828] ss:$16 sps:$4 sm:$0xff]  }
 0x26b   : > { %2715 = vmatprep.subr.bf16.mxu1 %v5714_v19  ;;  %v5795_v19 = vld [vmem:[%s7834_s4 + $0x844] ss:$16 sps:$4 sm:$0xff]  }
 0x26d   : > { %2673 = vmatpush1.bf16.msra.mxu0 %v5709_v50  ;;  %v5798_v50 = vld [vmem:[%s7834_s4 + $0x84c] ss:$16 sps:$4 sm:$0xff]  }
 0x26e   : > { %2716 = vmatpush1.bf16.msra.mxu1 %v5712_v10  ;;  %2674 = vmatprep.subr.bf16.mxu0 %v5717_v52  ;;  %v5793_v10 = vld [vmem:[%s7834_s4 + $0x840] ss:$16 sps:$4 sm:$0xff]   ;;  %v5796_v52 = vld [vmem:[%s7834_s4 + $0x848] ss:$16 sps:$4 sm:$0xff]  }
 0x26f   : > { %2717 = vmatprep.subr.bf16.mxu1 %v5720_v17  ;;  %v5801_v17 = vld [vmem:[%s7834_s4 + $0x864] ss:$16 sps:$4 sm:$0xff]  }
 0x271   : > { %2675 = vmatpush1.bf16.msra.mxu0 %v5715_v18  ;;  %v5804_v18 = vld [vmem:[%s7834_s4 + $0x86c] ss:$16 sps:$4 sm:$0xff]  }
 0x272   : > { %2718 = vmatpush1.bf16.msra.mxu1 %v5718_v20  ;;  %2676 = vmatprep.subr.bf16.mxu0 %v5723_v21  ;;  %v5799_v20 = vld [vmem:[%s7834_s4 + $0x860] ss:$16 sps:$4 sm:$0xff]   ;;  %v5802_v21 = vld [vmem:[%s7834_s4 + $0x868] ss:$16 sps:$4 sm:$0xff]  }
 0x273   : > { %2719 = vmatprep.subr.bf16.mxu1 %v5726_v22  ;;  %v5807_v22 = vld [vmem:[%s7834_s4 + $0x884] ss:$16 sps:$4 sm:$0xff]  }
 0x275   : > { %2677 = vmatpush1.bf16.msra.mxu0 %v5721_v24  ;;  %v5810_v24 = vld [vmem:[%s7834_s4 + $0x88c] ss:$16 sps:$4 sm:$0xff]  }
 0x276   : > { %2720 = vmatpush1.bf16.msra.mxu1 %v5724_v53  ;;  %2678 = vmatprep.subr.bf16.mxu0 %v5729_v25  ;;  %v5805_v53 = vld [vmem:[%s7834_s4 + $0x880] ss:$16 sps:$4 sm:$0xff]   ;;  %v5808_v25 = vld [vmem:[%s7834_s4 + $0x888] ss:$16 sps:$4 sm:$0xff]  }
 0x277   : > { %2721 = vmatprep.subr.bf16.mxu1 %v5732_v26  ;;  %v5813_v26 = vld [vmem:[%s7834_s4 + $0x8a4] ss:$16 sps:$4 sm:$0xff]  }
 0x279   : > { %2679 = vmatpush1.bf16.msra.mxu0 %v5727_v46  ;;  %v5811_v46 = vld [vmem:[%s7834_s4 + $0x8a0] ss:$16 sps:$4 sm:$0xff]  }
 0x27a   : > { %2722 = vmatpush1.bf16.msra.mxu1 %v5730_v28  ;;  %3117 = vmatprep.subr.bf16.mxu0 %v5735_v16  ;;  %v5814_v28 = vld [vmem:[%s7834_s4 + $0x8a8] ss:$16 sps:$4 sm:$0xff]   ;;  %v2746_v16 = vrot.slane %v6605_v15, 1 }
 0x27b   : > { %3160 = vmatprep.subr.bf16.mxu1 %v5738_v23 }
 0x27c   : > { %5015 = vmatmul.mubr.msk.bf16.vlgmr.msra.gmra.mrb[12].mxu0 %vm6574_vm10, %v2288_v31  ;;  %v2750_v29 = vsel %vm2748_vm5, %v2746_v16, 0  ;;  %v5845_v16 = vld [vmem:[%s7837_s7 + $0xd8] sm:$0xff]  }
 0x27d   : > { %5017 = vmatmul.mubr.msk.bf16.vlgmr.msra.gmra.mrb[4].mxu1 %vm6574_vm10, %v2288_v31  ;;  %3118 = vmatpush1.bf16.msra.mxu0 %v5733_v59 }
 0x27e   : > { %5131 = vmatprep.mubr.msk.bf16.mxu0 %vm1344_vm2, %v6580_v43  ;;  %3161 = vmatpush1.bf16.msra.mxu1 %v5736_v30 }
 0x27f   : > { %5133 = vmatprep.mubr.msk.bf16.mxu1 %vm1344_vm2, %v6580_v43  ;;  %3119 = vmatprep.subr.bf16.mxu0 %v5741_v12  ;;  %v5753_v43 = vld [vmem:[%s7834_s4 + $0x764] ss:$16 sps:$4 sm:$0xff]  }
 0x280   : > { %3162 = vmatprep.subr.bf16.mxu1 %v5744_v56 }
 0x281   : > { %3120 = vmatpush1.bf16.msra.mxu0 %v5739_v58 }
 0x282   : > { %3163 = vmatpush1.bf16.msra.mxu1 %v5742_v32  ;;  %3121 = vmatprep.subr.bf16.mxu0 %v5747_v33 }
 0x283   : > { %3164 = vmatprep.subr.bf16.mxu1 %v5750_v0 }
 0x285   : > { %3122 = vmatpush1.bf16.msra.mxu0 %v5745_v45  ;;  %v5820_v45 = vld [vmem:[%s7837_s7 + $0x8] sm:$0xff]  }
 0x286   : > { %3165 = vmatpush1.bf16.msra.mxu1 %v5748_v34  ;;  %3123 = vmatprep.subr.bf16.mxu0 %v5753_v43  ;;  %v5822_v34 = vld [vmem:[%s7837_s7 + $0x10] sm:$0xff]   ;;  %v5824_v43 = vld [vmem:[%s7837_s7 + $0x18] sm:$0xff]  }
 0x287   : > { %3166 = vmatprep.subr.bf16.mxu1 %v5756_v35  ;;  %v5826_v35 = vld [vmem:[%s7837_s7 + $0x20] sm:$0xff]  }
 0x289   : > { %3124 = vmatpush1.bf16.msra.mxu0 %v5751_v36  ;;  %v5828_v36 = vld [vmem:[%s7837_s7 + $0x28] sm:$0xff]  }
 0x28a   : > { %3167 = vmatpush1.bf16.msra.mxu1 %v5754_v37  ;;  %3125 = vmatprep.subr.bf16.mxu0 %v5759_v38  ;;  %v5830_v37 = vld [vmem:[%s7837_s7 + $0x30] sm:$0xff]   ;;  %v5832_v38 = vld [vmem:[%s7837_s7 + $0x38] sm:$0xff]  }
 0x28b   : > { %3168 = vmatprep.subr.bf16.mxu1 %v5762_v39  ;;  %v5834_v39 = vld [vmem:[%s7837_s7 + $0x40] sm:$0xff]  }
 0x28d   : > { %3126 = vmatpush1.bf16.msra.mxu0 %v5757_v40  ;;  %v5836_v40 = vld [vmem:[%s7837_s7 + $0x48] sm:$0xff]  }
 0x28e   : > { %3169 = vmatpush1.bf16.msra.mxu1 %v5760_v41  ;;  %3127 = vmatprep.subr.bf16.mxu0 %v5765_v48  ;;  %v5838_v41 = vld [vmem:[%s7837_s7 + $0x50] sm:$0xff]  }
 0x28f   : > { %3170 = vmatprep.subr.bf16.mxu1 %v5768_v54 }
 0x291   : > { %3128 = vmatpush1.bf16.msra.mxu0 %v5763_v57 }
 0x292   : > { %3171 = vmatpush1.bf16.msra.mxu1 %v5766_v60  ;;  %3129 = vmatprep.subr.bf16.mxu0 %v5771_v61 }
 0x293   : > { %3172 = vmatprep.subr.bf16.mxu1 %v5774_v62 }
 0x295   : > { %3130 = vmatpush1.bf16.msra.mxu0 %v5769_v63 }
 0x296   : > { %3173 = vmatpush1.bf16.msra.mxu1 %v5772_v44  ;;  %3131 = vmatprep.subr.bf16.mxu0 %v5777_v1 }
 0x297   : > { %3174 = vmatprep.subr.bf16.mxu1 %v5780_v49 }
 0x299   : > { %3132 = vmatpush1.bf16.msra.mxu0 %v5775_v2 }
 0x29a   : > { %3175 = vmatpush1.bf16.msra.mxu1 %v5778_v4  ;;  %3133 = vmatprep.subr.bf16.mxu0 %v5783_v5 }
 0x29b   : > { %3176 = vmatprep.subr.bf16.mxu1 %v5786_v6 }
 0x29d   : > { %3134 = vmatpush1.bf16.msra.mxu0 %v5781_v7 }
 0x29e   : > { %3177 = vmatpush1.bf16.msra.mxu1 %v5784_v8  ;;  %3135 = vmatprep.subr.bf16.mxu0 %v5789_v9 }
 0x29f   : > { %3178 = vmatprep.subr.bf16.mxu1 %v5792_v11 }
 0x2a1   : > { %3136 = vmatpush1.bf16.msra.mxu0 %v5787_v13 }
 0x2a2   : > { %3179 = vmatpush1.bf16.msra.mxu1 %v5790_v14  ;;  %3137 = vmatprep.subr.bf16.mxu0 %v5795_v19  ;;  %v5817_v14 = vld [vmem:[%s7836_s6] sm:$0xff]   ;;  %v5819_v19 = vld [vmem:[%s7837_s7 + $0x70] sm:$0xff]  }
 0x2a3   : > { %3180 = vmatprep.subr.bf16.mxu1 %v5798_v50  ;;  %v5821_v50 = vld [vmem:[%s7837_s7 + $0x78] sm:$0xff]  }
 0x2a5   : > { %3138 = vmatpush1.bf16.msra.mxu0 %v5793_v10  ;;  %v5823_v10 = vld [vmem:[%s7837_s7 + $0x80] sm:$0xff]  }
 0x2a6   : > { %3181 = vmatpush1.bf16.msra.mxu1 %v5796_v52  ;;  %3139 = vmatprep.subr.bf16.mxu0 %v5801_v17  ;;  %v5825_v52 = vld [vmem:[%s7837_s7 + $0x88] sm:$0xff]   ;;  %v5827_v17 = vld [vmem:[%s7837_s7 + $0x90] sm:$0xff]  }
 0x2a7   : > { %3182 = vmatprep.subr.bf16.mxu1 %v5804_v18  ;;  %v5829_v18 = vld [vmem:[%s7837_s7 + $0x98] sm:$0xff]  }
 0x2a9   : > { %3140 = vmatpush1.bf16.msra.mxu0 %v5799_v20  ;;  %v5831_v20 = vld [vmem:[%s7837_s7 + $0xa0] sm:$0xff]  }
 0x2aa   : > { %3183 = vmatpush1.bf16.msra.mxu1 %v5802_v21  ;;  %3141 = vmatprep.subr.bf16.mxu0 %v5807_v22  ;;  %v5833_v21 = vld [vmem:[%s7837_s7 + $0xa8] sm:$0xff]   ;;  %v5835_v22 = vld [vmem:[%s7837_s7 + $0xb0] sm:$0xff]  }
 0x2ab   : > { %3184 = vmatprep.subr.bf16.mxu1 %v5810_v24  ;;  %v5837_v24 = vld [vmem:[%s7837_s7 + $0xb8] sm:$0xff]  }
 0x2ad   : > { %3142 = vmatpush1.bf16.msra.mxu0 %v5805_v53  ;;  %v5839_v53 = vld [vmem:[%s7837_s7 + $0xc0] sm:$0xff]  }
 0x2ae   : > { %3185 = vmatpush1.bf16.msra.mxu1 %v5808_v25  ;;  %3143 = vmatprep.subr.bf16.mxu0 %v5813_v26  ;;  %v5840_v25 = vld [vmem:[%s7837_s7 + $0x58] sm:$0xff]   ;;  %v5841_v26 = vld [vmem:[%s7837_s7 + $0xc8] sm:$0xff]  }
 0x2af   : > { %3186 = vmatprep.subr.bf16.mxu1 %v5816_v27  ;;  %v5842_v27 = vld [vmem:[%s7837_s7 + $0x60] sm:$0xff]  }
 0x2b1   : > { %3144 = vmatpush1.bf16.msra.mxu0 %v5811_v46  ;;  %v5843_v46 = vld [vmem:[%s7837_s7 + $0xd0] sm:$0xff]  }
 0x2b2   : > { %3187 = vmatpush1.bf16.msra.mxu1 %v5814_v28  ;;  %3595 = vmatprep.subr.bf16.mxu0 %v5982_v42  ;;  %v5844_v28 = vld [vmem:[%s7837_s7 + $0x68] sm:$0xff]  }
 0x2b4   : > { %5132 = vmatmul.mubr.msk.bf16.vlgmr.msra.gmra.mrb[12].mxu0 %vm6546_vm6, %v2750_v29 }
 0x2b5   : > { %5134 = vmatmul.mubr.msk.bf16.vlgmr.msra.gmra.mrb[4].mxu1 %vm6546_vm6, %v2750_v29  ;;  %3596 = vmatpush1.bf16.msra.mxu0 %v5818_v55  ;;  %v3299_v29 = vld [vmem:[%s7835_s5] sm:$0x3] }
 0x2b6   : > { %3286 = vmatprep.mubr.bf16.mxu1 %v5982_v42  ;;  %3597 = vmatprep.subr.bf16.mxu0 %v5982_v42 }
 0x2b9   : > { %3598 = vmatpush1.bf16.msra.mxu0 %v5820_v45 }
 0x2ba   : > { %3599 = vmatprep.subr.bf16.mxu0 %v5982_v42 }
 0x2bd   : > { %3600 = vmatpush1.bf16.msra.mxu0 %v5822_v34  ;;  %v5847_v34 = vld [vmem:[%s7837_s7 + $0xe0] sm:$0xff]  }
 0x2be   : > { %3601 = vmatprep.subr.bf16.mxu0 %v5982_v42 }
 0x2c1   : > { %3602 = vmatpush1.bf16.msra.mxu0 %v5824_v43 }
 0x2c2   : > { %3603 = vmatprep.subr.bf16.mxu0 %v5982_v42 }
 0x2c5   : > { %3604 = vmatpush1.bf16.msra.mxu0 %v5826_v35 }
 0x2c6   : > { %3605 = vmatprep.subr.bf16.mxu0 %v5982_v42 }
 0x2c9   : > { %3606 = vmatpush1.bf16.msra.mxu0 %v5828_v36  ;;  %v5848_v36 = vld [vmem:[%s7837_s7 + $0x158] sm:$0xff]  }
 0x2ca   : > { %3607 = vmatprep.subr.bf16.mxu0 %v5982_v42 }
 0x2cd   : > { %3608 = vmatpush1.bf16.msra.mxu0 %v5830_v37 }
 0x2ce   : > { %3609 = vmatprep.subr.bf16.mxu0 %v5982_v42 }
 0x2d1   : > { %3610 = vmatpush1.bf16.msra.mxu0 %v5832_v38  ;;  %v5849_v38 = vld [vmem:[%s7837_s7 + $0xe8] sm:$0xff]  }
 0x2d2   : > { %3611 = vmatprep.subr.bf16.mxu0 %v5982_v42 }
 0x2d5   : > { %3612 = vmatpush1.bf16.msra.mxu0 %v5834_v39  ;;  %v5850_v39 = vld [vmem:[%s7837_s7 + $0x160] sm:$0xff]  }
 0x2d6   : > { %3613 = vmatprep.subr.bf16.mxu0 %v5982_v42 }
 0x2d9   : > { %3614 = vmatpush1.bf16.msra.mxu0 %v5836_v40  ;;  %v5851_v40 = vld [vmem:[%s7837_s7 + $0xf0] sm:$0xff]  }
 0x2da   : > { %3615 = vmatprep.subr.bf16.mxu0 %v5982_v42 }
 0x2dd   : > { %3616 = vmatpush1.bf16.msra.mxu0 %v5838_v41  ;;  %v5852_v41 = vld [vmem:[%s7837_s7 + $0x168] sm:$0xff]  }
 0x2de   : > { %3617 = vmatprep.subr.bf16.mxu0 %v5982_v42 }
 0x2e1   : > { %3618 = vmatpush1.bf16.msra.mxu0 %v5840_v25  ;;  %v5880_v25 = vld [vmem:[%s7837_s7 + $0x248] sm:$0xff]  }
 0x2e2   : > { %3619 = vmatprep.subr.bf16.mxu0 %v5982_v42 }
 0x2e5   : > { %3620 = vmatpush1.bf16.msra.mxu0 %v5842_v27  ;;  %v5882_v27 = vld [vmem:[%s7837_s7 + $0x250] sm:$0xff]  }
 0x2e6   : > { %3621 = vmatprep.subr.bf16.mxu0 %v5982_v42 }
 0x2e9   : > { %3622 = vmatpush1.bf16.msra.mxu0 %v5844_v28  ;;  %v5884_v28 = vld [vmem:[%s7837_s7 + $0x258] sm:$0xff]  }
 0x2ea   : > { %3914 = vmatprep.subr.bf16.mxu0 %v5982_v42 }
 0x387   : > { %v7325_v23 = vpop.f32.mrb[12].mxu0 }
 0x388   : > { %v3194_v59 = vpop.f32.mrb[4].mxu1  ;;  %v7327_v30 = vpop.f32.mrb[13].mxu0 }
 0x389   : > { %v3196_v15 = vpop.f32.mrb[5].mxu1  ;;  %v7329_v31 = vpop.f32.mrb[14].mxu0 }
 0x38a   : > { %v5322_v12 = vpack.i.bf16 %v3196_v15, %v3194_v59  ;;  %v3198_v56 = vpop.f32.mrb[6].mxu1  ;;  %v3157_v58 = vpop.f32.mrb[15].mxu0 }
 0x38b   : > { %v5332_v32 = vpack.i.bf16 %v3157_v58, %v7327_v30  ;;  %v3200_v33 = vpop.f32.mrb[7].mxu1 }
 0x38c   : > { %v5327_v0 = vpack.i.bf16 %v3200_v33, %v3198_v56  ;;  %5323 = vrot.lane.b32.xlu0 %v5322_v12, %s5980_s25 }
 0x38e   : > { %5328 = vrot.lane.b32.xlu1 %v5327_v0, %s5980_s25 }
 0x390   : > { %5333 = vrot.lane.b32.xlu0 %v5332_v32, %s5980_s25  ;;  %s5916_s25 = scalar_lea.vmem %s7790_s20, 16 }
 0x391   : > { %p5917_p12 = scmp.ne.s32.totalorder %s7790_s20, %s5916_s25  ;;  %p5924_p2 = scmp.lt.s32.totalorder %s5922_s0, %s5916_s25 }
 0x393   : > { %p5918_p13 = pnand %p5917_p12, %p6077_p5  ;;  %p5925_p3 = por %p5924_p2, %p5923_p1 }
 0x395   : > { %p5919_p0 = pneg %p5918_p13 }
 0x397   : > { %p5926_p4 = pnand %p5925_p3, %p5919_p0 }
 0x3fe   : > { %v5324_v48 = vpop.permute.xlu0 %5323 }
 0x3ff   : > { %v5326_v54 = vunpack.i.h.bf16 %v5324_v48  ;;  %v5325_v57 = vunpack.i.l.bf16 %v5324_v48  ;;  %v5853_v48 = vld [vmem:[%s7837_s7 + $0xf8] sm:$0xff]  }
 0x400   : > { %v5329_v60 = vpop.permute.xlu1 %5328 }
 0x401   : > { %v3230_v61 = vsel %vm855_vm12, %v5325_v57, %v5326_v54  ;;  %v5331_v62 = vunpack.i.h.bf16 %v5329_v60  ;;  %v5330_v63 = vunpack.i.l.bf16 %v5329_v60  ;;  %v5854_v54 = vld [vmem:[%s7837_s7 + $0x170] sm:$0xff]   ;;  %v5856_v60 = vld [vmem:[%s7837_s7 + $0x178] sm:$0xff]  }
 0x402   : > { %v5334_v44 = vpop.permute.xlu0 %5333  ;;  %v3238_v4 = vmax.f32 %v7327_v30, %v3230_v61  ;;  %v3304_v30 = vrot.slane %v3299_v29, %v872_v47  ;;  %v5857_v61 = vld [vmem:[%s7837_s7 + $0x108] sm:$0xff]  }
 0x403   : > { %v3232_v1 = vsel %vm855_vm12, %v5330_v63, %v5331_v62  ;;  %v5336_v49 = vunpack.i.h.bf16 %v5334_v44  ;;  %v5335_v2 = vunpack.i.l.bf16 %v5334_v44  ;;  %v5858_v62 = vld [vmem:[%s7837_s7 + $0x180] sm:$0xff]   ;;  %v5860_v44 = vld [vmem:[%s7837_s7 + $0x188] sm:$0xff]  }
 0x404   : > { %v3240_v5 = vmax.f32 %v3157_v58, %v3232_v1  ;;  %v5861_v1 = vld [vmem:[%s7837_s7 + $0x118] sm:$0xff]  }
 0x405   : > { %v3231_v6 = vsel %vm855_vm12, %v5336_v49, %v5330_v63  ;;  %v3229_v7 = vsel %vm855_vm12, %v5335_v2, %v5325_v57  ;;  %v5855_v57 = vld [vmem:[%s7837_s7 + $0x100] sm:$0xff]   ;;  %v5859_v63 = vld [vmem:[%s7837_s7 + $0x110] sm:$0xff]   ;;  %vm4434_vm12 = vcmask 73728  }
 0x406   : > { %v3239_v8 = vmax.f32 %v7329_v31, %v3231_v6  ;;  %v3237_v9 = vmax.f32 %v7325_v23, %v3229_v7  ;;  %v3244_v11 = vpack.c.bf16 %v3240_v5, %v3238_v4  ;;  %v3308_v31 = vrot.slane %v3299_v29, %v876_v51  ;;  %v5862_v49 = vld [vmem:[%s7837_s7 + $0x190] sm:$0xff]   ;;  %v5863_v2 = vld [vmem:[%s7837_s7 + $0x120] sm:$0xff]   ;;  %v5864_v4 = vld [vmem:[%s7837_s7 + $0x198] sm:$0xff]  }
 0x407   : > { %v5865_v5 = vld [vmem:[%s7837_s7 + $0x128] sm:$0xff]   ;;  %v5866_v6 = vld [vmem:[%s7837_s7 + $0x1a0] sm:$0xff]   ;;  %v5867_v7 = vld [vmem:[%s7837_s7 + $0x130] sm:$0xff]  }
 0x408   : > { %3254 = vmatprep.subr.bf16.mxu1 %v3244_v11  ;;  %v3243_v13 = vpack.c.bf16 %v3239_v8, %v3237_v9  ;;  %v5868_v8 = vld [vmem:[%s7837_s7 + $0x1a8] sm:$0xff]   ;;  %v5869_v9 = vld [vmem:[%s7837_s7 + $0x138] sm:$0xff]   ;;  %v5870_v11 = vld [vmem:[%s7837_s7 + $0x1b0] sm:$0xff]  }
 0x409   : > { %v5886_v29 = vld [vmem:[%s7837_s7 + $0x260] sm:$0xff]  }
 0x40a   : > { %3255 = vmatpush1.bf16.msra.mxu1 %v3243_v13  ;;  %v5871_v13 = vld [vmem:[%s7837_s7 + $0x140] sm:$0xff]  }
 0x40b   : > { %3469 = vmatprep.subr.bf16.mxu1 %v5982_v42 }
 0x40d   : > { %5136 = vmatmul.mubr.msk.bf16.vlgmr.msra.gmra.mrb[8].mxu1 %vm3250_vm11, %v5817_v14  ;;  %v5872_v14 = vld [vmem:[%s7837_s7 + $0x1b8] sm:$0xff]  }
 0x40e   : > { %3470 = vmatpush1.bf16.msra.mxu1 %v5819_v19  ;;  %v5873_v19 = vld [vmem:[%s7837_s7 + $0x148] sm:$0xff]  }
 0x40f   : > { %3471 = vmatprep.subr.bf16.mxu1 %v5982_v42 }
 0x412   : > { %3472 = vmatpush1.bf16.msra.mxu1 %v5821_v50  ;;  %v5874_v50 = vld [vmem:[%s7837_s7 + $0x230] sm:$0xff]  }
 0x413   : > { %3473 = vmatprep.subr.bf16.mxu1 %v5982_v42 }
 0x416   : > { %3474 = vmatpush1.bf16.msra.mxu1 %v5823_v10 }
 0x417   : > { %3475 = vmatprep.subr.bf16.mxu1 %v5982_v42 }
 0x41a   : > { %3476 = vmatpush1.bf16.msra.mxu1 %v5825_v52 }
 0x41b   : > { %3477 = vmatprep.subr.bf16.mxu1 %v5982_v42 }
 0x41e   : > { %3478 = vmatpush1.bf16.msra.mxu1 %v5827_v17  ;;  %v5875_v17 = vld [vmem:[%s7837_s7 + $0x1c0] sm:$0xff]  }
 0x41f   : > { %3479 = vmatprep.subr.bf16.mxu1 %v5982_v42 }
 0x422   : > { %3480 = vmatpush1.bf16.msra.mxu1 %v5829_v18 }
 0x423   : > { %3481 = vmatprep.subr.bf16.mxu1 %v5982_v42 }
 0x426   : > { %3482 = vmatpush1.bf16.msra.mxu1 %v5831_v20 }
 0x427   : > { %3483 = vmatprep.subr.bf16.mxu1 %v5982_v42 }
 0x42a   : > { %3484 = vmatpush1.bf16.msra.mxu1 %v5833_v21  ;;  %v5876_v21 = vld [vmem:[%s7837_s7 + $0x238] sm:$0xff]  }
 0x42b   : > { %3485 = vmatprep.subr.bf16.mxu1 %v5982_v42 }
 0x42e   : > { %3486 = vmatpush1.bf16.msra.mxu1 %v5835_v22  ;;  %v5877_v22 = vld [vmem:[%s7837_s7 + $0x1c8] sm:$0xff]  }
 0x42f   : > { %3487 = vmatprep.subr.bf16.mxu1 %v5982_v42 }
 0x432   : > { %3488 = vmatpush1.bf16.msra.mxu1 %v5837_v24  ;;  %v5878_v24 = vld [vmem:[%s7837_s7 + $0x240] sm:$0xff]  }
 0x433   : > { %3489 = vmatprep.subr.bf16.mxu1 %v5982_v42 }
 0x436   : > { %3490 = vmatpush1.bf16.msra.mxu1 %v5839_v53  ;;  %v5879_v53 = vld [vmem:[%s7837_s7 + $0x1d0] sm:$0xff]  }
 0x437   : > { %3491 = vmatprep.subr.bf16.mxu1 %v5982_v42 }
 0x43a   : > { %3492 = vmatpush1.bf16.msra.mxu1 %v5841_v26  ;;  %v5881_v26 = vld [vmem:[%s7837_s7 + $0x1d8] sm:$0xff]  }
 0x43b   : > { %3493 = vmatprep.subr.bf16.mxu1 %v5982_v42 }
 0x43e   : > { %3494 = vmatpush1.bf16.msra.mxu1 %v5843_v46  ;;  %v5883_v46 = vld [vmem:[%s7837_s7 + $0x1e0] sm:$0xff]  }
 0x43f   : > { %3495 = vmatprep.subr.bf16.mxu1 %v5982_v42 }
 0x442   : > { %3496 = vmatpush1.bf16.msra.mxu1 %v5845_v16  ;;  %v5885_v16 = vld [vmem:[%s7837_s7 + $0x1e8] sm:$0xff]  }
 0x443   : > { %3755 = vmatprep.subr.bf16.mxu1 %v5982_v42 }
 0x4e0   : > { %v3288_v23 = vpop.f32.mrb[8].mxu1 }
 0x4e1   : > { %v3290_v59 = vpop.f32.mrb[9].mxu1 }
 0x4e2   : > { %v3292_v15 = vpop.f32.mrb[10].mxu1 }
 0x4e3   : > { %v3297_v12 = vmax.f32 %v3288_v23, %v3292_v15  ;;  %v3294_v56 = vpop.f32.mrb[11].mxu1  ;;  %v5887_v23 = vld [vmem:[%s7837_s7 + $0x1f0] sm:$0xff]  }
 0x4e4   : > { %v3298_v58 = vmax.f32 %v3290_v59, %v3294_v56  ;;  %v5888_v59 = vld [vmem:[%s7837_s7 + $0x268] sm:$0xff]   ;;  %v5890_v15 = vld [vmem:[%s7837_s7 + $0x270] sm:$0xff]  }
 0x4e5   : > { %v3311_v32 = vadd.f32 %v3304_v30, %v3297_v12  ;;  %v5889_v30 = vld [vmem:[%s7837_s7 + $0x1f8] sm:$0xff]   ;;  %v5893_v56 = vld [vmem:[%s7837_s7 + $0x208] sm:$0xff]  }
 0x4e6   : > { %v3312_v33 = vadd.f32 %v3308_v31, %v3298_v58  ;;  %v5891_v31 = vld [vmem:[%s7837_s7 + $0x200] sm:$0xff]   ;;  %v5892_v12 = vld [vmem:[%s7837_s7 + $0x278] sm:$0xff]  }
 0x4e7   : > { %v3313_v0 = vmax.f32 %v3311_v32, 0.0  ;;  %v5894_v58 = vld [vmem:[%s7837_s7 + $0x280] sm:$0xff]   ;;  %v5895_v32 = vld [vmem:[%s7837_s7 + $0x210] sm:$0xff]  }
 0x4e8   : > { %v3314_v55 = vmax.f32 %v3312_v33, 0.0  ;;  %v5896_v33 = vld [vmem:[%s7837_s7 + $0x288] sm:$0xff]  }
 0x4e9   : > { %3315 = vst [vmem:[%s399_s11] sm:$0xff] %v3313_v0  ;;  %v7470_v45 = vpack.c.bf16 %v3313_v0, %v3313_v0  ;;  %v5897_v0 = vld [vmem:[%s7837_s7 + $0x218] sm:$0xff]  }
 0x4ea   : > { %3316 = vst.msk [vmem:[%s399_s11 + $0x8] sm:$0xff] %vm1344_vm2, %v3314_v55  ;;  %v7473_v47 = vpack.c.bf16 %v3314_v55, %v3314_v55  ;;  %v5898_v55 = vld [vmem:[%s7837_s7 + $0x290] sm:$0xff]   ;;  %s5242_s11 = sshll.u32 %s6060_s17, 4  ;;  %s4437_s17 = scalar_lea.sflag [#allocation3], %s372_s29 }
 0x4eb   : > { %v7488_v43 = vshrl.u32 %v7470_v45, 16  ;;  %v3665_v18 = vrot.slane %v7470_v45, 1  ;;  %s7788_s27 = scalar_lea.hbm %s7839_s9, %s5242_s11 }
 0x4ec   : > { %5166 = vmatprep.mubr.msk.bf16.mxu0 %vm1344_vm2, %v7473_v47  ;;  %v7481_v51 = vshrl.u32 %v7473_v47, 16  ;;  %v3666_v35 = vrot.slane %v7473_v47, 1  ;;  %v3984_v20 = vrot.slane %v7473_v47, 2 }
 0x4ed   : > { %3628 = vmatmul.mubr.bf16.vlgmr.msra.gmra.mrb[16].mxu0 %v7470_v45  ;;  %v3824_v10 = vrot.slane %v7488_v43, 1 }
 0x4ee   : > { %3915 = vmatpush1.bf16.msra.mxu0 %v5846_v3  ;;  %5151 = vmatprep.mubr.msk.bf16.mxu1 %vm1344_vm2, %v7481_v51  ;;  %v3825_v37 = vrot.slane %v7481_v51, 1  ;;  %v4143_v52 = vrot.slane %v7481_v51, 2  ;;  %v5899_v3 = vld [vmem:[%s7837_s7 + $0x220] sm:$0xff]   ;;  %v5900_v51 = vld [vmem:[%s7837_s7 + $0x298] sm:$0xff]  }
 0x4ef   : > { %3502 = vmatmul.mubr.bf16.vlgmr.msra.gmra.mrb[12].mxu1 %v7488_v43  ;;  %3916 = vmatprep.subr.bf16.mxu0 %v5982_v42 }
 0x4f0   : > { %3756 = vmatpush1.bf16.msra.mxu1 %v5847_v34  ;;  %5181 = vmatprep.mubr.msk.bf16.mxu1 %vm1344_vm2, %v3666_v35  ;;  %v5901_v34 = vld [vmem:[%s7837_s7 + $0x228] sm:$0xff]   ;;  %v4142_v35 = vrot.slane %v7488_v43, 2 }
 0x4f1   : > { %3757 = vmatprep.subr.bf16.mxu1 %v5982_v42  ;;  %5196 = vmatprep.mubr.msk.bf16.mxu0 %vm1344_vm2, %v3825_v37  ;;  %v3983_v37 = vrot.slane %v7470_v45, 2  ;;  %v5903_v43 = vld [vmem:[%s7837_s7 + $0x2a8] sm:$0xff]  }
 0x4f2   : > { %3917 = vmatpush1.bf16.msra.mxu0 %v5848_v36  ;;  %v5902_v36 = vld [vmem:[%s7837_s7 + $0x2a0] sm:$0xff]  }
 0x4f3   : > { %3918 = vmatprep.subr.bf16.mxu0 %v5982_v42 }
 0x4f4   : > { %3758 = vmatpush1.bf16.msra.mxu1 %v5849_v38  ;;  %v4302_v38 = vrot.slane %v7473_v47, 3  ;;  %v5905_v47 = vld [vmem:[%s7837_s7 + $0x2b8] sm:$0xff]  }
 0x4f5   : > { %3759 = vmatprep.subr.bf16.mxu1 %v5982_v42 }
 0x4f6   : > { %3919 = vmatpush1.bf16.msra.mxu0 %v5850_v39  ;;  %v5904_v39 = vld [vmem:[%s7837_s7 + $0x2b0] sm:$0xff]  }
 0x4f7   : > { %3920 = vmatprep.subr.bf16.mxu0 %v5982_v42 }
 0x4f8   : > { %3760 = vmatpush1.bf16.msra.mxu1 %v5851_v40  ;;  %v5906_v40 = vld [vmem:[%s7837_s7 + $0x2c0] sm:$0xff]  }
 0x4f9   : > { %3761 = vmatprep.subr.bf16.mxu1 %v5982_v42 }
 0x4fa   : > { %3921 = vmatpush1.bf16.msra.mxu0 %v5852_v41  ;;  %v5907_v41 = vld [vmem:[%s7837_s7 + $0x2c8] sm:$0xff]  }
 0x4fb   : > { %3922 = vmatprep.subr.bf16.mxu0 %v5982_v42 }
 0x4fc   : > { %3762 = vmatpush1.bf16.msra.mxu1 %v5853_v48  ;;  %v5908_v48 = vld [vmem:[%s7837_s7 + $0x2d0] sm:$0xff]  }
 0x4fd   : > { %3763 = vmatprep.subr.bf16.mxu1 %v5982_v42 }
 0x4fe   : > { %3923 = vmatpush1.bf16.msra.mxu0 %v5854_v54  ;;  %v5909_v54 = vld [vmem:[%s7837_s7 + $0x2d8] sm:$0xff]  }
 0x4ff   : > { %3924 = vmatprep.subr.bf16.mxu0 %v5982_v42 }
 0x500   : > { %3764 = vmatpush1.bf16.msra.mxu1 %v5855_v57  ;;  %v5910_v57 = vld [vmem:[%s7837_s7 + $0x2e0] sm:$0xff]  }
 0x501   : > { %3765 = vmatprep.subr.bf16.mxu1 %v5982_v42 }
 0x502   : > { %3925 = vmatpush1.bf16.msra.mxu0 %v5856_v60  ;;  %v5911_v60 = vld [vmem:[%s7837_s7 + $0x2e8] sm:$0xff]  }
 0x503   : > { %3926 = vmatprep.subr.bf16.mxu0 %v5982_v42 }
 0x504   : > { %3766 = vmatpush1.bf16.msra.mxu1 %v5857_v61  ;;  %v5912_v61 = vld [vmem:[%s7837_s7 + $0x2f0] sm:$0xff]  }
 0x505   : > { %3767 = vmatprep.subr.bf16.mxu1 %v5982_v42 }
 0x506   : > { %3927 = vmatpush1.bf16.msra.mxu0 %v5858_v62  ;;  %v5913_v62 = vld [vmem:[%s7837_s7 + $0x2f8] sm:$0xff]  }
 0x507   : > { %3928 = vmatprep.subr.bf16.mxu0 %v5982_v42 }
 0x508   : > { %3768 = vmatpush1.bf16.msra.mxu1 %v5859_v63  ;;  %v5914_v63 = vld [vmem:[%s7837_s7 + $0x300] sm:$0xff]  }
 0x509   : > { %3769 = vmatprep.subr.bf16.mxu1 %v5982_v42 }
 0x50a   : > { %3929 = vmatpush1.bf16.msra.mxu0 %v5860_v44  ;;  %v5915_v44 = vld [vmem:[%s7837_s7 + $0x308] sm:$0xff]  }
 0x50b   : > { %3930 = vmatprep.subr.bf16.mxu0 %v5982_v42 }
 0x50c   : > { %3770 = vmatpush1.bf16.msra.mxu1 %v5861_v1  ;;  %v4301_v1 = vrot.slane %v7470_v45, 3 }
 0x50d   : > { %3771 = vmatprep.subr.bf16.mxu1 %v5982_v42 }
 0x50e   : > { %3931 = vmatpush1.bf16.msra.mxu0 %v5862_v49 }
 0x50f   : > { %3932 = vmatprep.subr.bf16.mxu0 %v5982_v42 }
 0x510   : > { %3772 = vmatpush1.bf16.msra.mxu1 %v5863_v2 }
 0x511   : > { %3773 = vmatprep.subr.bf16.mxu1 %v5982_v42 }
 0x512   : > { %3933 = vmatpush1.bf16.msra.mxu0 %v5864_v4 }
 0x513   : > { %3934 = vmatprep.subr.bf16.mxu0 %v5982_v42 }
 0x514   : > { %3774 = vmatpush1.bf16.msra.mxu1 %v5865_v5 }
 0x515   : > { %3775 = vmatprep.subr.bf16.mxu1 %v5982_v42 }
 0x516   : > { %3935 = vmatpush1.bf16.msra.mxu0 %v5866_v6 }
 0x517   : > { %3936 = vmatprep.subr.bf16.mxu0 %v5982_v42 }
 0x518   : > { %3776 = vmatpush1.bf16.msra.mxu1 %v5867_v7 }
 0x519   : > { %3777 = vmatprep.subr.bf16.mxu1 %v5982_v42 }
 0x51a   : > { %3937 = vmatpush1.bf16.msra.mxu0 %v5868_v8 }
 0x51b   : > { %3938 = vmatprep.subr.bf16.mxu0 %v5982_v42 }
 0x51c   : > { %3778 = vmatpush1.bf16.msra.mxu1 %v5869_v9 }
 0x51d   : > { %3779 = vmatprep.subr.bf16.mxu1 %v5982_v42 }
 0x51e   : > { %3939 = vmatpush1.bf16.msra.mxu0 %v5870_v11 }
 0x51f   : > { %3940 = vmatprep.subr.bf16.mxu0 %v5982_v42 }
 0x520   : > { %3780 = vmatpush1.bf16.msra.mxu1 %v5871_v13 }
 0x521   : > { %3781 = vmatprep.subr.bf16.mxu1 %v5982_v42 }
 0x522   : > { %3941 = vmatpush1.bf16.msra.mxu0 %v5872_v14 }
 0x523   : > { %4232 = vmatprep.subr.bf16.mxu0 %v5982_v42 }
 0x524   : > { %3782 = vmatpush1.bf16.msra.mxu1 %v5873_v19 }
 0x525   : > { %3947 = vmatmul.mubr.bf16.vlgmr.msra.gmra.mrb[20].mxu0 %v3824_v10  ;;  %4073 = vmatprep.subr.bf16.mxu1 %v5982_v42 }
 0x526   : > { %4233 = vmatpush1.bf16.msra.mxu0 %v5874_v50  ;;  %5226 = vmatprep.mubr.msk.bf16.mxu0 %vm1344_vm2, %v4143_v52 }
 0x527   : > { %3788 = vmatmul.mubr.bf16.vlgmr.msra.gmra.mrb[16].mxu1 %v3665_v18  ;;  %4234 = vmatprep.subr.bf16.mxu0 %v5982_v42 }
 0x528   : > { %4074 = vmatpush1.bf16.msra.mxu1 %v5875_v17  ;;  %5211 = vmatprep.mubr.msk.bf16.mxu1 %vm1344_vm2, %v3984_v20 }
 0x529   : > { %4075 = vmatprep.subr.bf16.mxu1 %v5982_v42 }
 0x52a   : > { %4235 = vmatpush1.bf16.msra.mxu0 %v5876_v21 }
 0x52b   : > { %4236 = vmatprep.subr.bf16.mxu0 %v5982_v42 }
 0x52c   : > { %4076 = vmatpush1.bf16.msra.mxu1 %v5877_v22 }
 0x52d   : > { %4077 = vmatprep.subr.bf16.mxu1 %v5982_v42 }
 0x52e   : > { %4237 = vmatpush1.bf16.msra.mxu0 %v5878_v24 }
 0x52f   : > { %4238 = vmatprep.subr.bf16.mxu0 %v5982_v42 }
 0x530   : > { %4078 = vmatpush1.bf16.msra.mxu1 %v5879_v53 }
 0x531   : > { %4079 = vmatprep.subr.bf16.mxu1 %v5982_v42 }
 0x532   : > { %4239 = vmatpush1.bf16.msra.mxu0 %v5880_v25 }
 0x533   : > { %4240 = vmatprep.subr.bf16.mxu0 %v5982_v42 }
 0x534   : > { %4080 = vmatpush1.bf16.msra.mxu1 %v5881_v26 }
 0x535   : > { %4081 = vmatprep.subr.bf16.mxu1 %v5982_v42 }
 0x536   : > { %4241 = vmatpush1.bf16.msra.mxu0 %v5882_v27 }
 0x537   : > { %4242 = vmatprep.subr.bf16.mxu0 %v5982_v42 }
 0x538   : > { %4082 = vmatpush1.bf16.msra.mxu1 %v5883_v46 }
 0x539   : > { %4083 = vmatprep.subr.bf16.mxu1 %v5982_v42 }
 0x53a   : > { %4243 = vmatpush1.bf16.msra.mxu0 %v5884_v28 }
 0x53b   : > { %4244 = vmatprep.subr.bf16.mxu0 %v5982_v42 }
 0x53c   : > { %4084 = vmatpush1.bf16.msra.mxu1 %v5885_v16 }
 0x53d   : > { %4085 = vmatprep.subr.bf16.mxu1 %v5982_v42 }
 0x53e   : > { %4245 = vmatpush1.bf16.msra.mxu0 %v5886_v29  ;;  %v4432_v29 = vld [vmem:[%s7838_s8] sm:$0x1] }
 0x53f   : > { %4246 = vmatprep.subr.bf16.mxu0 %v5982_v42 }
 0x540   : > { %4086 = vmatpush1.bf16.msra.mxu1 %v5887_v23 }
 0x541   : > { %4087 = vmatprep.subr.bf16.mxu1 %v5982_v42 }
 0x542   : > { %4247 = vmatpush1.bf16.msra.mxu0 %v5888_v59 }
 0x543   : > { %4248 = vmatprep.subr.bf16.mxu0 %v5982_v42 }
 0x544   : > { %4088 = vmatpush1.bf16.msra.mxu1 %v5889_v30 }
 0x545   : > { %4089 = vmatprep.subr.bf16.mxu1 %v5982_v42 }
 0x546   : > { %4249 = vmatpush1.bf16.msra.mxu0 %v5890_v15 }
 0x547   : > { %4250 = vmatprep.subr.bf16.mxu0 %v5982_v42 }
 0x548   : > { %4090 = vmatpush1.bf16.msra.mxu1 %v5891_v31 }
 0x549   : > { %4091 = vmatprep.subr.bf16.mxu1 %v5982_v42 }
 0x54a   : > { %4251 = vmatpush1.bf16.msra.mxu0 %v5892_v12 }
 0x54b   : > { %4252 = vmatprep.subr.bf16.mxu0 %v5982_v42 }
 0x54c   : > { %4092 = vmatpush1.bf16.msra.mxu1 %v5893_v56 }
 0x54d   : > { %4093 = vmatprep.subr.bf16.mxu1 %v5982_v42 }
 0x54e   : > { %4253 = vmatpush1.bf16.msra.mxu0 %v5894_v58 }
 0x54f   : > { %4254 = vmatprep.subr.bf16.mxu0 %v5982_v42 }
 0x550   : > { %4094 = vmatpush1.bf16.msra.mxu1 %v5895_v32 }
 0x551   : > { %4095 = vmatprep.subr.bf16.mxu1 %v5982_v42 }
 0x552   : > { %4255 = vmatpush1.bf16.msra.mxu0 %v5896_v33 }
 0x553   : > { %4256 = vmatprep.subr.bf16.mxu0 %v5982_v42 }
 0x554   : > { %4096 = vmatpush1.bf16.msra.mxu1 %v5897_v0 }
 0x555   : > { %4097 = vmatprep.subr.bf16.mxu1 %v5982_v42 }
 0x556   : > { %4257 = vmatpush1.bf16.msra.mxu0 %v5898_v55 }
 0x557   : > { %4258 = vmatprep.subr.bf16.mxu0 %v5982_v42 }
 0x558   : > { %4098 = vmatpush1.bf16.msra.mxu1 %v5899_v3 }
 0x559   : > { %4099 = vmatprep.subr.bf16.mxu1 %v5982_v42 }
 0x55a   : > { %4259 = vmatpush1.bf16.msra.mxu0 %v5900_v51 }
 0x55c   : > { %4100 = vmatpush1.bf16.msra.mxu1 %v5901_v34 }
 0x55d   : > { %4265 = vmatmul.mubr.bf16.vlgmr.msra.gmra.mrb[24].mxu0 %v4142_v35  ;;  %4391 = vmatprep.subr.bf16.mxu1 %v5982_v42 }
 0x55f   : > { %4106 = vmatmul.mubr.bf16.vlgmr.msra.gmra.mrb[20].mxu1 %v3983_v37 }
 0x560   : > { %4392 = vmatpush1.bf16.msra.mxu1 %v5902_v36  ;;  %5241 = vmatprep.mubr.msk.bf16.mxu1 %vm1344_vm2, %v4302_v38 }
 0x561   : > { %4393 = vmatprep.subr.bf16.mxu1 %v5982_v42 }
 0x564   : > { %4394 = vmatpush1.bf16.msra.mxu1 %v5903_v43 }
 0x565   : > { %4395 = vmatprep.subr.bf16.mxu1 %v5982_v42 }
 0x568   : > { %4396 = vmatpush1.bf16.msra.mxu1 %v5904_v39 }
 0x569   : > { %4397 = vmatprep.subr.bf16.mxu1 %v5982_v42 }
 0x56c   : > { %4398 = vmatpush1.bf16.msra.mxu1 %v5905_v47 }
 0x56d   : > { %4399 = vmatprep.subr.bf16.mxu1 %v5982_v42 }
 0x570   : > { %4400 = vmatpush1.bf16.msra.mxu1 %v5906_v40 }
 0x571   : > { %4401 = vmatprep.subr.bf16.mxu1 %v5982_v42 }
 0x574   : > { %4402 = vmatpush1.bf16.msra.mxu1 %v5907_v41 }
 0x575   : > { %4403 = vmatprep.subr.bf16.mxu1 %v5982_v42 }
 0x578   : > { %4404 = vmatpush1.bf16.msra.mxu1 %v5908_v48 }
 0x579   : > { %4405 = vmatprep.subr.bf16.mxu1 %v5982_v42 }
 0x57c   : > { %4406 = vmatpush1.bf16.msra.mxu1 %v5909_v54 }
 0x57d   : > { %4407 = vmatprep.subr.bf16.mxu1 %v5982_v42 }
 0x580   : > { %4408 = vmatpush1.bf16.msra.mxu1 %v5910_v57 }
 0x581   : > { %4409 = vmatprep.subr.bf16.mxu1 %v5982_v42 }
 0x584   : > { %4410 = vmatpush1.bf16.msra.mxu1 %v5911_v60 }
 0x585   : > { %4411 = vmatprep.subr.bf16.mxu1 %v5982_v42 }
 0x588   : > { %4412 = vmatpush1.bf16.msra.mxu1 %v5912_v61 }
 0x589   : > { %4413 = vmatprep.subr.bf16.mxu1 %v5982_v42 }
 0x58c   : > { %4414 = vmatpush1.bf16.msra.mxu1 %v5913_v62 }
 0x58d   : > { %4415 = vmatprep.subr.bf16.mxu1 %v5982_v42 }
 0x590   : > { %4416 = vmatpush1.bf16.msra.mxu1 %v5914_v63 }
 0x591   : > { %4417 = vmatprep.subr.bf16.mxu1 %v5982_v42 }
 0x594   : > { %4418 = vmatpush1.bf16.msra.mxu1 %v5915_v44 }
 0x597   : > { %4424 = vmatmul.mubr.bf16.vlgmr.msra.gmra.mrb[24].mxu1 %v4301_v1 }
 0x5c0   : > { %v3629_v49 = vpop.f32.mrb[16].mxu0 }
 0x5c1   : > { %v3631_v2 = vpop.f32.mrb[17].mxu0 }
 0x5c2   : > { %v3503_v4 = vpop.f32.mrb[12].mxu1  ;;  %v3632_v5 = vpop.f32.mrb[18].mxu0 }
 0x5c3   : > { %v3630_v6 = vadd.f32 %v3629_v49, %v3503_v4  ;;  %v3505_v7 = vpop.f32.mrb[13].mxu1  ;;  %v3633_v8 = vpop.f32.mrb[19].mxu0 }
 0x5c4   : > { %v3506_v9 = vpop.f32.mrb[14].mxu1 }
 0x5c5   : > { %v3507_v11 = vpop.f32.mrb[15].mxu1 }
 0x5f8   : > { %v3948_v13 = vpop.f32.mrb[20].mxu0 }
 0x5f9   : > { %v3950_v14 = vpop.f32.mrb[21].mxu0 }
 0x5fa   : > { %v3789_v19 = vpop.f32.mrb[16].mxu1  ;;  %v3951_v50 = vpop.f32.mrb[22].mxu0 }
 0x5fb   : > { %v3795_v10 = vadd.f32 %v3789_v19, %v3630_v6  ;;  %v3791_v42 = vpop.f32.mrb[17].mxu1  ;;  %v3952_v52 = vpop.f32.mrb[23].mxu0 }
 0x5fc   : > { %v3792_v17 = vpop.f32.mrb[18].mxu1 }
 0x5fd   : > { %v3793_v45 = vpop.f32.mrb[19].mxu1  ;;  %v3954_v18 = vadd.f32 %v3948_v13, %v3795_v10 }
 0x630   : > { %v4266_v20 = vpop.f32.mrb[24].mxu0 }
 0x631   : > { %v4268_v21 = vpop.f32.mrb[25].mxu0 }
 0x632   : > { %v4107_v22 = vpop.f32.mrb[20].mxu1  ;;  %v4269_v24 = vpop.f32.mrb[26].mxu0 }
 0x633   : > { %v4113_v53 = vadd.f32 %v4107_v22, %v3954_v18  ;;  %v4109_v25 = vpop.f32.mrb[21].mxu1  ;;  %v4270_v26 = vpop.f32.mrb[27].mxu0 }
 0x634   : > { %v4110_v27 = vpop.f32.mrb[22].mxu1 }
 0x635   : > { %v4111_v46 = vpop.f32.mrb[23].mxu1  ;;  %v4272_v28 = vadd.f32 %v4266_v20, %v4113_v53 }
 0x66a   : > { %v4425_v16 = vpop.f32.mrb[24].mxu1 }
 0x66b   : > { %v4431_v23 = vadd.f32 %v4425_v16, %v4272_v28  ;;  %v4427_v59 = vpop.f32.mrb[25].mxu1 }
 0x66c   : > { %v4428_v30 = vpop.f32.mrb[26].mxu1 }
 0x66d   : > { %v4433_v15 = vadd.f32 %v4432_v29, %v4431_v23  ;;  %v4429_v31 = vpop.f32.mrb[27].mxu1 }
 0x66f   : > { %4435 = vst.msk [vmem:[%s373_s12] sm:$0x1] %vm4434_vm12, %v4433_v15 }
 0x670   : > { %5929 = shalt.err (!%p5926_p4)
}
 0x671   : > { %s5930_s29 = scalar_lea.hbm %s7788_s27, 16  ;;  %s5934_s12 = scalar_lea.hbm %s7839_s9, 32 }
 0x672   : > { %p5931_p7 = scmp.ne.s32.totalorder %s7788_s27, %s5930_s29  ;;  %p5935_p10 = scmp.lt.u32.totalorder %s7788_s27, %s7839_s9 }
 0x673   : > { %p5936_p11 = scmp.lt.u32.totalorder %s5934_s12, %s5930_s29  ;;  %p5938_p13 = scmp.lt.u32.totalorder %s5930_s29, %s7788_s27 }
 0x674   : > { %p5932_p8 = pnand %p5931_p7, %p6077_p5 }
 0x675   : > { %p5937_p12 = por %p5936_p11, %p5935_p10 }
 0x676   : > { %p5933_p9 = pneg %p5932_p8 }
 0x677   : > { %p5939_p0 = por %p5938_p13, %p5937_p12 }
 0x679   : > { %p5940_p1 = pnand %p5939_p0, %p5933_p9 }
 0x67b   : > { %5943 = shalt.err (!%p5940_p1)
}
 0x67c   : > { %5280 = dma.vmem_to_hbm [thread:$0]  (%p6077_p5), %s7790_s20, 16, %s7788_s27, %s4437_s17  }
 0x67d PF: > { %p5286_p2 = scmp.ge.s32.totalorder %s5978_s16, 2  ;;  %s4469_s25 = sand.u32 1, %s5966_s13  }
 0x67e   : > { %s4470_s28 = scalar_lea.sflag [#allocation3], %s4469_s25 }
 0x67f   : > { %p5283_p3 = pnand %p5286_p2, %p6081_p6 }
 0x681   : > { %5961 = dma.done.wait (!%p5283_p3), %s4470_s28, 16  }
 0x682   : > { %5963 = vsyncadd (!%p5283_p3), %s4470_s28, 4294967280  ;;  %p21_p4 = scmp.ge.s32.totalorder %s6064_s19, 4   ;;  %s7859_s13 = smov %s5970_s14 }
 0x683   : > { %s7860_s14 = smov %s5974_s15  ;;  %s7861_s15 = smov %s6075_s22 }
 0x684   : > { %s7862_s16 = smov %s6064_s19  ;;  %23 = sbr.rel (!%p21_p4) target bundleno = 5 (0x5), region = 110 }
 0x68b   :  { %4482 = vsyncpa [#allocation3], 1 }
 0x68c   :  { %4484 = vsyncpa [#allocation3 + $0x1], 1 }

</bundles_post_ra>
